<compile_context>
chip_gen: v5e
topology: v5e:2x2
jax: 0.10.0
libtpu: 0.0.40
codegen_flags: <defaults>
</compile_context>

<pallas_src>
import jax
import jax.numpy as jnp
from jax.experimental import pallas as pl
from jax.experimental.pallas import tpu as pltpu  # noqa: F401  (not needed at toy size)

# ---- small, forward-consistent config -------------------------------------------------
B = 2                 # batch
S = 8                 # sequence length
H = 32                # hidden_size
NUM_HEADS = 4
HEAD_DIM = H // NUM_HEADS
GRP = 3 * HEAD_DIM    # per-head q|k|v column group in the fused QKV projection output
FFN = 64              # intermediate size
NUM_CLASSES = 3
CONTINUE_LAYERS = 2   # config.continue_layer_nums (layers run inside MYBertContinue)
LN_EPS = 1e-12
FC_PAD = 128          # lane-dense classifier output width (sliced to NUM_CLASSES outside)

PARAM_ORDER = ("wqkv", "bqkv", "wo", "bo", "ln1g", "ln1b",
               "w1", "b1", "w2", "b2", "ln2g", "ln2b",
               "wp", "bp", "wfc", "bfc")


# ---- shared math helpers (used both inside the kernel and in the JAX reference) --------
def _layernorm(x, g, b):
    mu = jnp.mean(x, axis=-1, keepdims=True)
    var = jnp.mean((x - mu) ** 2, axis=-1, keepdims=True)
    return (x - mu) * jax.lax.rsqrt(var + LN_EPS) * g + b


def _gelu(x):
    # tanh-approx GELU (BERT's "gelu_new"); maps onto the EUP tanh unit on TPU.
    c = jnp.sqrt(jnp.float32(2.0 / jnp.pi))
    return 0.5 * x * (1.0 + jnp.tanh(c * (x + 0.044715 * x * x * x)))


# ---- Pallas kernel: full fused forward (all layers + pooler + classifier) ---------------
def fused_forward_kernel(h_ref, mask_ref,
                         wqkv_ref, bqkv_ref, wo_ref, bo_ref,
                         ln1g_ref, ln1b_ref, w1_ref, b1_ref, w2_ref, b2_ref,
                         ln2g_ref, ln2b_ref,
                         wp_ref, bp_ref, wfc_ref, bfc_ref,
                         out_ref):
    bf16 = jnp.bfloat16
    f32 = jnp.float32

    hf = h_ref[...].reshape(B * S, H)                       # (B*S, H) f32 activations
    # Additive attention mask, broadcast ONCE (hoisted: JAX does not CSE broadcast_in_dim)
    # onto the (head, batch)-stacked score layout used below.
    mask_nb = jnp.broadcast_to(mask_ref[...],
                               (NUM_HEADS, B, S, S)).reshape(NUM_HEADS * B, S, S)
    scale = f32(1.0 / (HEAD_DIM ** 0.5))

    for l in range(CONTINUE_LAYERS):                        # static unroll over layers
        # ---- fused QKV projection: ONE MXU issue + ONE bias add instead of three ----
        qkv = jnp.dot(hf.astype(bf16), wqkv_ref[l],
                      preferred_element_type=f32) + bqkv_ref[l]          # (B*S, 3H)

        # ---- head split: one contiguous 3*HD lane slice per head, single stack ------
        blk = jnp.stack(
            [qkv[:, n * GRP:(n + 1) * GRP].reshape(B, S, GRP)
             for n in range(NUM_HEADS)], axis=0).reshape(NUM_HEADS * B, S, GRP)
        qh = (blk[:, :, 0:HEAD_DIM] * scale).astype(bf16)   # scale folded into q
        kh = blk[:, :, HEAD_DIM:2 * HEAD_DIM].astype(bf16)
        vh = blk[:, :, 2 * HEAD_DIM:3 * HEAD_DIM].astype(bf16)

        # ---- attention: batched contractions over all (head, batch) pairs -----------
        sc = jnp.einsum('bqd,bkd->bqk', qh, kh,
                        preferred_element_type=f32) + mask_nb            # (NH*B, S, S)
        sc = sc - jnp.max(sc, axis=-1, keepdims=True)
        probs = jnp.exp(sc)
        probs = probs * pl.reciprocal(jnp.sum(probs, axis=-1, keepdims=True),
                                      approx=True)
        ctx = jnp.einsum('bqk,bkd->bqd', probs.astype(bf16), vh,
                         preferred_element_type=f32)                     # (NH*B, S, HD)

        # ---- merge heads back to (B*S, H): one lane concat ---------------------------
        ctx4 = ctx.reshape(NUM_HEADS, B, S, HEAD_DIM)
        ctx2 = jnp.concatenate([ctx4[n] for n in range(NUM_HEADS)],
                               axis=-1).reshape(B * S, H)

        attn = jnp.dot(ctx2.astype(bf16), wo_ref[l],
                       preferred_element_type=f32) + bo_ref[l]
        h1 = _layernorm(hf + attn, ln1g_ref[l], ln1b_ref[l])             # f32

        inter = _gelu(jnp.dot(h1.astype(bf16), w1_ref[l],
                              preferred_element_type=f32) + b1_ref[l])   # f32
        ffn = jnp.dot(inter.astype(bf16), w2_ref[l],
                      preferred_element_type=f32) + b2_ref[l]
        hf = _layernorm(h1 + ffn, ln2g_ref[l], ln2b_ref[l])

    # BERT pooler on the [CLS] token of every batch row, then dropout(identity) + fc.
    cls = hf.reshape(B, S, H)[:, 0, :]                                   # (B, H)
    pooled = jnp.tanh(jnp.dot(cls.astype(bf16), wp_ref[...],
                              preferred_element_type=f32) + bp_ref[...])
    # nn.Dropout(config.dropout) is identity at inference (module used in eval mode).
    out_ref[...] = jnp.dot(pooled.astype(bf16), wfc_ref[...],
                           preferred_element_type=f32) + bfc_ref[...]    # (B, FC_PAD)


# ---- wrapper-side weight preparation (done ONCE, outside the hot path) ------------------
def _interleave_qkv(wq, wk, wv):
    # (H,H) x3 -> (H,3H) with columns ordered (head, {q,k,v}, head_dim) so the kernel can
    # take ONE contiguous 3*HEAD_DIM lane slice per head from the fused QKV matmul output.
    stk = jnp.stack([wq.reshape(H, NUM_HEADS, HEAD_DIM),
                     wk.reshape(H, NUM_HEADS, HEAD_DIM),
                     wv.reshape(H, NUM_HEADS, HEAD_DIM)], axis=2)        # (H, NH, 3, HD)
    return stk.reshape(H, 3 * H)


def _interleave_qkv_bias(bq, bk, bv):
    stk = jnp.stack([bq.reshape(NUM_HEADS, HEAD_DIM),
                     bk.reshape(NUM_HEADS, HEAD_DIM),
                     bv.reshape(NUM_HEADS, HEAD_DIM)], axis=1)           # (NH, 3, HD)
    return stk.reshape(1, 3 * H)


def prepare_params(layer_params, wp, bp, wfc, bfc):
    """Stack per-layer weights, fuse/interleave QKV, cast matmul operands to bf16, and
    zero-pad the classifier to a lane-dense 128-wide output."""
    bf16 = jnp.bfloat16
    stack = lambda name: jnp.stack([lp[name] for lp in layer_params], axis=0)
    p = {
        "wqkv": jnp.stack([_interleave_qkv(lp["wq"], lp["wk"], lp["wv"])
                           for lp in layer_params], axis=0).astype(bf16),
        "bqkv": jnp.stack([_interleave_qkv_bias(lp["bq"], lp["bk"], lp["bv"])
                           for lp in layer_params], axis=0),             # f32
        "wo": stack("wo").astype(bf16),   "bo": stack("bo"),
        "ln1g": stack("ln1g"),            "ln1b": stack("ln1b"),
        "w1": stack("w1").astype(bf16),   "b1": stack("b1"),
        "w2": stack("w2").astype(bf16),   "b2": stack("b2"),
        "ln2g": stack("ln2g"),            "ln2b": stack("ln2b"),
        "wp": wp.astype(bf16),            "bp": bp,
        "wfc": jnp.zeros((H, FC_PAD), bf16).at[:, :NUM_CLASSES].set(wfc.astype(bf16)),
        "bfc": jnp.zeros((1, FC_PAD), jnp.float32).at[:, :NUM_CLASSES].set(bfc),
    }
    return p


# ---- wrapper: one pallas_call for the whole forward -------------------------------------
@jax.jit
def model_forward(hidden_states, ext_mask, params):
    # Compact additive mask (a few KB at real sizes) — broadcast happens inside the kernel.
    mask_c = ext_mask.reshape(1, B, 1, S)
    out_pad = pl.pallas_call(
        fused_forward_kernel,
        out_shape=jax.ShapeDtypeStruct((B, FC_PAD), jnp.float32),
    )(hidden_states, mask_c, *[params[name] for name in PARAM_ORDER])
    return out_pad[:, :NUM_CLASSES]


# ---- pure-JAX f32 reference (exact math, original weight layout) ------------------------
def _ref_layer(h, mask2d, p):
    q = h @ p["wq"] + p["bq"]
    k = h @ p["wk"] + p["bk"]
    v = h @ p["wv"] + p["bv"]
    scale = 1.0 / jnp.sqrt(jnp.float32(HEAD_DIM))
    outs = []
    for hh in range(NUM_HEADS):
        sl = slice(hh * HEAD_DIM, (hh + 1) * HEAD_DIM)
        sc = q[..., sl] @ jnp.swapaxes(k[..., sl], -1, -2) * scale + mask2d[:, None, :]
        sc = sc - jnp.max(sc, axis=-1, keepdims=True)
        pr = jnp.exp(sc)
        pr = pr / jnp.sum(pr, axis=-1, keepdims=True)
        outs.append(pr @ v[..., sl])
    ctx = jnp.concatenate(outs, axis=-1)
    attn = ctx @ p["wo"] + p["bo"]
    h1 = _layernorm(h + attn, p["ln1g"], p["ln1b"])
    ffn = _gelu(h1 @ p["w1"] + p["b1"]) @ p["w2"] + p["b2"]
    return _layernorm(h1 + ffn, p["ln2g"], p["ln2b"])


def ref_forward(hidden_states, mask2d, layer_params, wp, bp, wfc, bfc):
    h = hidden_states
    for lp in layer_params:
        h = _ref_layer(h, mask2d, lp)
    pooled = jnp.tanh(h[:, 0, :] @ wp + bp)
    return pooled @ wfc + bfc


# ---- deterministic parameter init -------------------------------------------------------
def init_layer_params(key):
    ks = jax.random.split(key, 6)
    init = lambda k, shp: (0.02 * jax.random.normal(k, shp)).astype(jnp.float32)
    return {
        "wq": init(ks[0], (H, H)),   "bq": jnp.zeros((1, H), jnp.float32),
        "wk": init(ks[1], (H, H)),   "bk": jnp.zeros((1, H), jnp.float32),
        "wv": init(ks[2], (H, H)),   "bv": jnp.zeros((1, H), jnp.float32),
        "wo": init(ks[3], (H, H)),   "bo": jnp.zeros((1, H), jnp.float32),
        "ln1g": jnp.ones((1, H), jnp.float32), "ln1b": jnp.zeros((1, H), jnp.float32),
        "w1": init(ks[4], (H, FFN)), "b1": jnp.zeros((1, FFN), jnp.float32),
        "w2": init(ks[5], (FFN, H)), "b2": jnp.zeros((1, H), jnp.float32),
        "ln2g": jnp.ones((1, H), jnp.float32), "ln2b": jnp.zeros((1, H), jnp.float32),
    }


if __name__ == "__main__":
    key = jax.random.PRNGKey(0)
    k_h, k_layers, k_pool, k_fc = jax.random.split(key, 4)

    # hidden_states produced by the frozen `mybert` prefix (synthesized here).
    hidden_states = jax.random.normal(k_h, (B, S, H), dtype=jnp.float32)

    # binary attention mask (second example has 2 padded positions) -> extended additive mask
    attn_mask = jnp.array([[1] * S, [1] * (S - 2) + [0] * 2], dtype=jnp.float32)  # (B, S)
    ext_mask = ((1.0 - attn_mask) * -1e4).reshape(B, 1, S)

    layer_keys = jax.random.split(k_layers, CONTINUE_LAYERS)
    layer_params = [init_layer_params(k) for k in layer_keys]

    wp = (0.02 * jax.random.normal(k_pool, (H, H))).astype(jnp.float32)          # pooler.dense
    bp = jnp.zeros((1, H), jnp.float32)
    wfc = (0.02 * jax.random.normal(k_fc, (H, NUM_CLASSES))).astype(jnp.float32)  # self.fc
    bfc = jnp.zeros((1, NUM_CLASSES), jnp.float32)

    params = prepare_params(layer_params, wp, bp, wfc, bfc)   # one-time weight prep

    out = model_forward(hidden_states, ext_mask, params)
    out = jax.block_until_ready(out)

    ref = ref_forward(hidden_states, (1.0 - attn_mask) * -1e4, layer_params, wp, bp, wfc, bfc)

    assert out.shape == (B, NUM_CLASSES), out.shape
    assert bool(jnp.all(jnp.isfinite(out)))
    # Tolerance covers bf16 MXU operands + approx-reciprocal softmax vs the exact-f32 ref.
    assert bool(jnp.allclose(out, ref, atol=1e-2, rtol=1e-2)), (out, ref)
    print("KERNEL_OK")
</pallas_src>

<mosaic_0001>
module attributes {stable_mosaic.version = 11 : i64} {
  func.func @fused_forward_kernel(%arg0: memref<2x8x32xf32, #tpu.memory_space<vmem>>, %arg1: memref<1x2x1x8xf32, #tpu.memory_space<vmem>>, %arg2: memref<2x32x96xbf16, #tpu.memory_space<vmem>>, %arg3: memref<2x1x96xf32, #tpu.memory_space<vmem>>, %arg4: memref<2x32x32xbf16, #tpu.memory_space<vmem>>, %arg5: memref<2x1x32xf32, #tpu.memory_space<vmem>>, %arg6: memref<2x1x32xf32, #tpu.memory_space<vmem>>, %arg7: memref<2x1x32xf32, #tpu.memory_space<vmem>>, %arg8: memref<2x32x64xbf16, #tpu.memory_space<vmem>>, %arg9: memref<2x1x64xf32, #tpu.memory_space<vmem>>, %arg10: memref<2x64x32xbf16, #tpu.memory_space<vmem>>, %arg11: memref<2x1x32xf32, #tpu.memory_space<vmem>>, %arg12: memref<2x1x32xf32, #tpu.memory_space<vmem>>, %arg13: memref<2x1x32xf32, #tpu.memory_space<vmem>>, %arg14: memref<32x32xbf16, #tpu.memory_space<vmem>>, %arg15: memref<1x32xf32, #tpu.memory_space<vmem>>, %arg16: memref<32x128xbf16, #tpu.memory_space<vmem>>, %arg17: memref<1x128xf32, #tpu.memory_space<vmem>>, %arg18: memref<2x128xf32, #tpu.memory_space<vmem>>) attributes {dimension_semantics = [], scalar_prefetch = 0 : i64, scratch_operands = 0 : i64, tpu.core_type = #tpu.core_type<tc>} {
    %c0 = arith.constant 0 : index
    %c0_0 = arith.constant 0 : index
    %c0_1 = arith.constant 0 : index
    %0 = vector.load %arg0[%c0, %c0_0, %c0_1] : memref<2x8x32xf32, #tpu.memory_space<vmem>>, vector<2x8x32xf32>
    %1 = vector.shape_cast %0 : vector<2x8x32xf32> to vector<16x32xf32>
    %c0_2 = arith.constant 0 : index
    %c0_3 = arith.constant 0 : index
    %c0_4 = arith.constant 0 : index
    %c0_5 = arith.constant 0 : index
    %2 = vector.load %arg1[%c0_2, %c0_3, %c0_4, %c0_5] : memref<1x2x1x8xf32, #tpu.memory_space<vmem>>, vector<1x2x1x8xf32>
    %3 = vector.shape_cast %2 : vector<1x2x1x8xf32> to vector<1x2x1x8xf32>
    %4 = vector.broadcast %3 : vector<1x2x1x8xf32> to vector<4x2x8x8xf32>
    %5 = vector.shape_cast %4 : vector<4x2x8x8xf32> to vector<8x8x8xf32>
    %6 = arith.truncf %1 : vector<16x32xf32> to vector<16x32xbf16>
    %c0_6 = arith.constant 0 : index
    %c0_7 = arith.constant 0 : index
    %c0_8 = arith.constant 0 : index
    %7 = vector.load %arg2[%c0_6, %c0_7, %c0_8] : memref<2x32x96xbf16, #tpu.memory_space<vmem>>, vector<1x32x96xbf16>
    %8 = vector.shape_cast %7 : vector<1x32x96xbf16> to vector<32x96xbf16>
    %cst = arith.constant dense<0.000000e+00> : vector<16x96xf32>
    %9 = tpu.matmul %6, %8, %cst {dimension_numbers = #tpu.dot_dimension_numbers<[1], [0], [0], [1], [0, 0, 1, 1], [], []>} : vector<16x32xbf16>, vector<32x96xbf16>, vector<16x96xf32> -> vector<16x96xf32>
    %c0_9 = arith.constant 0 : index
    %c0_10 = arith.constant 0 : index
    %c0_11 = arith.constant 0 : index
    %10 = vector.load %arg3[%c0_9, %c0_10, %c0_11] : memref<2x1x96xf32, #tpu.memory_space<vmem>>, vector<1x1x96xf32>
    %11 = vector.shape_cast %10 : vector<1x1x96xf32> to vector<1x96xf32>
    %12 = vector.broadcast %11 : vector<1x96xf32> to vector<16x96xf32>
    %13 = arith.addf %9, %12 : vector<16x96xf32>
    %14 = vector.extract_strided_slice %13 {offsets = [0, 0], sizes = [16, 24], strides = [1, 1]} : vector<16x96xf32> to vector<16x24xf32>
    %15 = vector.shape_cast %14 : vector<16x24xf32> to vector<2x8x24xf32>
    %16 = vector.extract_strided_slice %13 {offsets = [0, 24], sizes = [16, 24], strides = [1, 1]} : vector<16x96xf32> to vector<16x24xf32>
    %17 = vector.shape_cast %16 : vector<16x24xf32> to vector<2x8x24xf32>
    %18 = vector.extract_strided_slice %13 {offsets = [0, 48], sizes = [16, 24], strides = [1, 1]} : vector<16x96xf32> to vector<16x24xf32>
    %19 = vector.shape_cast %18 : vector<16x24xf32> to vector<2x8x24xf32>
    %20 = vector.extract_strided_slice %13 {offsets = [0, 72], sizes = [16, 24], strides = [1, 1]} : vector<16x96xf32> to vector<16x24xf32>
    %21 = vector.shape_cast %20 : vector<16x24xf32> to vector<2x8x24xf32>
    %22 = vector.shape_cast %15 : vector<2x8x24xf32> to vector<1x2x8x24xf32>
    %23 = vector.shape_cast %17 : vector<2x8x24xf32> to vector<1x2x8x24xf32>
    %24 = vector.shape_cast %19 : vector<2x8x24xf32> to vector<1x2x8x24xf32>
    %25 = vector.shape_cast %21 : vector<2x8x24xf32> to vector<1x2x8x24xf32>
    %26 = tpu.concatenate %22, %23, %24, %25 in 0 : vector<1x2x8x24xf32>, vector<1x2x8x24xf32>, vector<1x2x8x24xf32>, vector<1x2x8x24xf32> -> vector<4x2x8x24xf32>
    %27 = vector.shape_cast %26 : vector<4x2x8x24xf32> to vector<8x8x24xf32>
    %28 = vector.extract_strided_slice %27 {offsets = [0, 0, 0], sizes = [8, 8, 8], strides = [1, 1, 1]} : vector<8x8x24xf32> to vector<8x8x8xf32>
    %cst_12 = arith.constant 0.353553385 : f32
    %29 = vector.broadcast %cst_12 : f32 to vector<8x8x8xf32>
    %30 = arith.mulf %28, %29 : vector<8x8x8xf32>
    %31 = arith.truncf %30 : vector<8x8x8xf32> to vector<8x8x8xbf16>
    %32 = vector.extract_strided_slice %27 {offsets = [0, 0, 8], sizes = [8, 8, 8], strides = [1, 1, 1]} : vector<8x8x24xf32> to vector<8x8x8xf32>
    %33 = arith.truncf %32 : vector<8x8x8xf32> to vector<8x8x8xbf16>
    %34 = vector.extract_strided_slice %27 {offsets = [0, 0, 16], sizes = [8, 8, 8], strides = [1, 1, 1]} : vector<8x8x24xf32> to vector<8x8x8xf32>
    %35 = arith.truncf %34 : vector<8x8x8xf32> to vector<8x8x8xbf16>
    "tpu.trace_start"() <{level = 10 : i32, message = "bqd,bkd->bqk"}> : () -> ()
    %cst_13 = arith.constant dense<0.000000e+00> : vector<8x8x8xf32>
    %36 = tpu.matmul %31, %33, %cst_13 {dimension_numbers = #tpu.dot_dimension_numbers<[2], [2], [1], [1], [0, 0, 0, 1, 1, 1], [0], [0]>} : vector<8x8x8xbf16>, vector<8x8x8xbf16>, vector<8x8x8xf32> -> vector<8x8x8xf32>
    "tpu.trace_stop"() : () -> ()
    %37 = arith.addf %36, %5 : vector<8x8x8xf32>
    %cst_14 = arith.constant dense<0xFF800000> : vector<8x8xf32>
    %38 = vector.multi_reduction <maximumf>, %37, %cst_14 [2] : vector<8x8x8xf32> to vector<8x8xf32>
    %39 = vector.shape_cast %38 : vector<8x8xf32> to vector<8x8x1xf32>
    %40 = vector.broadcast %39 : vector<8x8x1xf32> to vector<8x8x8xf32>
    %41 = arith.subf %37, %40 : vector<8x8x8xf32>
    %42 = math.exp %41 : vector<8x8x8xf32>
    %cst_15 = arith.constant dense<0.000000e+00> : vector<8x8xf32>
    %43 = vector.multi_reduction <add>, %42, %cst_15 [2] : vector<8x8x8xf32> to vector<8x8xf32>
    %44 = vector.shape_cast %43 : vector<8x8xf32> to vector<8x8x1xf32>
    %45 = tpu.reciprocal %44 {approx = true} : vector<8x8x1xf32> -> vector<8x8x1xf32>
    %46 = vector.broadcast %45 : vector<8x8x1xf32> to vector<8x8x8xf32>
    %47 = arith.mulf %42, %46 : vector<8x8x8xf32>
    %48 = arith.truncf %47 : vector<8x8x8xf32> to vector<8x8x8xbf16>
    "tpu.trace_start"() <{level = 10 : i32, message = "bqk,bkd->bqd"}> : () -> ()
    %cst_16 = arith.constant dense<0.000000e+00> : vector<8x8x8xf32>
    %49 = tpu.matmul %48, %35, %cst_16 {dimension_numbers = #tpu.dot_dimension_numbers<[2], [1], [1], [2], [0, 0, 0, 1, 1, 2], [0], [0]>} : vector<8x8x8xbf16>, vector<8x8x8xbf16>, vector<8x8x8xf32> -> vector<8x8x8xf32>
    "tpu.trace_stop"() : () -> ()
    %50 = vector.shape_cast %49 : vector<8x8x8xf32> to vector<4x2x8x8xf32>
    %51 = vector.extract_strided_slice %50 {offsets = [0, 0, 0, 0], sizes = [1, 2, 8, 8], strides = [1, 1, 1, 1]} : vector<4x2x8x8xf32> to vector<1x2x8x8xf32>
    %52 = vector.shape_cast %51 : vector<1x2x8x8xf32> to vector<2x8x8xf32>
    %53 = vector.extract_strided_slice %50 {offsets = [1, 0, 0, 0], sizes = [1, 2, 8, 8], strides = [1, 1, 1, 1]} : vector<4x2x8x8xf32> to vector<1x2x8x8xf32>
    %54 = vector.shape_cast %53 : vector<1x2x8x8xf32> to vector<2x8x8xf32>
    %55 = vector.extract_strided_slice %50 {offsets = [2, 0, 0, 0], sizes = [1, 2, 8, 8], strides = [1, 1, 1, 1]} : vector<4x2x8x8xf32> to vector<1x2x8x8xf32>
    %56 = vector.shape_cast %55 : vector<1x2x8x8xf32> to vector<2x8x8xf32>
    %57 = vector.extract_strided_slice %50 {offsets = [3, 0, 0, 0], sizes = [1, 2, 8, 8], strides = [1, 1, 1, 1]} : vector<4x2x8x8xf32> to vector<1x2x8x8xf32>
    %58 = vector.shape_cast %57 : vector<1x2x8x8xf32> to vector<2x8x8xf32>
    %59 = tpu.concatenate %52, %54, %56, %58 in 2 : vector<2x8x8xf32>, vector<2x8x8xf32>, vector<2x8x8xf32>, vector<2x8x8xf32> -> vector<2x8x32xf32>
    %60 = vector.shape_cast %59 : vector<2x8x32xf32> to vector<16x32xf32>
    %61 = arith.truncf %60 : vector<16x32xf32> to vector<16x32xbf16>
    %c0_17 = arith.constant 0 : index
    %c0_18 = arith.constant 0 : index
    %c0_19 = arith.constant 0 : index
    %62 = vector.load %arg4[%c0_17, %c0_18, %c0_19] : memref<2x32x32xbf16, #tpu.memory_space<vmem>>, vector<1x32x32xbf16>
    %63 = vector.shape_cast %62 : vector<1x32x32xbf16> to vector<32x32xbf16>
    %cst_20 = arith.constant dense<0.000000e+00> : vector<16x32xf32>
    %64 = tpu.matmul %61, %63, %cst_20 {dimension_numbers = #tpu.dot_dimension_numbers<[1], [0], [0], [1], [0, 0, 1, 1], [], []>} : vector<16x32xbf16>, vector<32x32xbf16>, vector<16x32xf32> -> vector<16x32xf32>
    %c0_21 = arith.constant 0 : index
    %c0_22 = arith.constant 0 : index
    %c0_23 = arith.constant 0 : index
    %65 = vector.load %arg5[%c0_21, %c0_22, %c0_23] : memref<2x1x32xf32, #tpu.memory_space<vmem>>, vector<1x1x32xf32>
    %66 = vector.shape_cast %65 : vector<1x1x32xf32> to vector<1x32xf32>
    %67 = vector.broadcast %66 : vector<1x32xf32> to vector<16x32xf32>
    %68 = arith.addf %64, %67 : vector<16x32xf32>
    %69 = arith.addf %1, %68 : vector<16x32xf32>
    %c0_24 = arith.constant 0 : index
    %c0_25 = arith.constant 0 : index
    %c0_26 = arith.constant 0 : index
    %70 = vector.load %arg6[%c0_24, %c0_25, %c0_26] : memref<2x1x32xf32, #tpu.memory_space<vmem>>, vector<1x1x32xf32>
    %71 = vector.shape_cast %70 : vector<1x1x32xf32> to vector<1x32xf32>
    %c0_27 = arith.constant 0 : index
    %c0_28 = arith.constant 0 : index
    %c0_29 = arith.constant 0 : index
    %72 = vector.load %arg7[%c0_27, %c0_28, %c0_29] : memref<2x1x32xf32, #tpu.memory_space<vmem>>, vector<1x1x32xf32>
    %73 = vector.shape_cast %72 : vector<1x1x32xf32> to vector<1x32xf32>
    %cst_30 = arith.constant dense<0.000000e+00> : vector<16xf32>
    %74 = vector.multi_reduction <add>, %69, %cst_30 [1] : vector<16x32xf32> to vector<16xf32>
    %75 = vector.shape_cast %74 : vector<16xf32> to vector<16x1xf32>
    %cst_31 = arith.constant 3.200000e+01 : f32
    %76 = vector.broadcast %cst_31 : f32 to vector<16x1xf32>
    %77 = arith.divf %75, %76 : vector<16x1xf32>
    %78 = vector.broadcast %77 : vector<16x1xf32> to vector<16x32xf32>
    %79 = arith.subf %69, %78 : vector<16x32xf32>
    %80 = arith.mulf %79, %79 : vector<16x32xf32>
    %cst_32 = arith.constant dense<0.000000e+00> : vector<16xf32>
    %81 = vector.multi_reduction <add>, %80, %cst_32 [1] : vector<16x32xf32> to vector<16xf32>
    %82 = vector.shape_cast %81 : vector<16xf32> to vector<16x1xf32>
    %cst_33 = arith.constant 3.200000e+01 : f32
    %83 = vector.broadcast %cst_33 : f32 to vector<16x1xf32>
    %84 = arith.divf %82, %83 : vector<16x1xf32>
    %85 = vector.broadcast %77 : vector<16x1xf32> to vector<16x32xf32>
    %86 = arith.subf %69, %85 : vector<16x32xf32>
    %cst_34 = arith.constant 9.99999996E-13 : f32
    %87 = vector.broadcast %cst_34 : f32 to vector<16x1xf32>
    %88 = arith.addf %84, %87 : vector<16x1xf32>
    %89 = math.rsqrt %88 : vector<16x1xf32>
    %90 = vector.broadcast %89 : vector<16x1xf32> to vector<16x32xf32>
    %91 = arith.mulf %86, %90 : vector<16x32xf32>
    %92 = vector.broadcast %71 : vector<1x32xf32> to vector<16x32xf32>
    %93 = arith.mulf %91, %92 : vector<16x32xf32>
    %94 = vector.broadcast %73 : vector<1x32xf32> to vector<16x32xf32>
    %95 = arith.addf %93, %94 : vector<16x32xf32>
    %96 = arith.truncf %95 : vector<16x32xf32> to vector<16x32xbf16>
    %c0_35 = arith.constant 0 : index
    %c0_36 = arith.constant 0 : index
    %c0_37 = arith.constant 0 : index
    %97 = vector.load %arg8[%c0_35, %c0_36, %c0_37] : memref<2x32x64xbf16, #tpu.memory_space<vmem>>, vector<1x32x64xbf16>
    %98 = vector.shape_cast %97 : vector<1x32x64xbf16> to vector<32x64xbf16>
    %cst_38 = arith.constant dense<0.000000e+00> : vector<16x64xf32>
    %99 = tpu.matmul %96, %98, %cst_38 {dimension_numbers = #tpu.dot_dimension_numbers<[1], [0], [0], [1], [0, 0, 1, 1], [], []>} : vector<16x32xbf16>, vector<32x64xbf16>, vector<16x64xf32> -> vector<16x64xf32>
    %c0_39 = arith.constant 0 : index
    %c0_40 = arith.constant 0 : index
    %c0_41 = arith.constant 0 : index
    %100 = vector.load %arg9[%c0_39, %c0_40, %c0_41] : memref<2x1x64xf32, #tpu.memory_space<vmem>>, vector<1x1x64xf32>
    %101 = vector.shape_cast %100 : vector<1x1x64xf32> to vector<1x64xf32>
    %102 = vector.broadcast %101 : vector<1x64xf32> to vector<16x64xf32>
    %103 = arith.addf %99, %102 : vector<16x64xf32>
    %cst_42 = arith.constant 0.636619746 : f32
    %104 = math.sqrt %cst_42 : f32
    %cst_43 = arith.constant 5.000000e-01 : f32
    %105 = vector.broadcast %cst_43 : f32 to vector<16x64xf32>
    %106 = arith.mulf %105, %103 : vector<16x64xf32>
    %cst_44 = arith.constant 4.471500e-02 : f32
    %107 = vector.broadcast %cst_44 : f32 to vector<16x64xf32>
    %108 = arith.mulf %107, %103 : vector<16x64xf32>
    %109 = arith.mulf %108, %103 : vector<16x64xf32>
    %110 = arith.mulf %109, %103 : vector<16x64xf32>
    %111 = arith.addf %103, %110 : vector<16x64xf32>
    %112 = vector.broadcast %104 : f32 to vector<16x64xf32>
    %113 = arith.mulf %112, %111 : vector<16x64xf32>
    %114 = math.tanh %113 : vector<16x64xf32>
    %cst_45 = arith.constant 1.000000e+00 : f32
    %115 = vector.broadcast %cst_45 : f32 to vector<16x64xf32>
    %116 = arith.addf %115, %114 : vector<16x64xf32>
    %117 = arith.mulf %106, %116 : vector<16x64xf32>
    %118 = arith.truncf %117 : vector<16x64xf32> to vector<16x64xbf16>
    %c0_46 = arith.constant 0 : index
    %c0_47 = arith.constant 0 : index
    %c0_48 = arith.constant 0 : index
    %119 = vector.load %arg10[%c0_46, %c0_47, %c0_48] : memref<2x64x32xbf16, #tpu.memory_space<vmem>>, vector<1x64x32xbf16>
    %120 = vector.shape_cast %119 : vector<1x64x32xbf16> to vector<64x32xbf16>
    %cst_49 = arith.constant dense<0.000000e+00> : vector<16x32xf32>
    %121 = tpu.matmul %118, %120, %cst_49 {dimension_numbers = #tpu.dot_dimension_numbers<[1], [0], [0], [1], [0, 0, 1, 1], [], []>} : vector<16x64xbf16>, vector<64x32xbf16>, vector<16x32xf32> -> vector<16x32xf32>
    %c0_50 = arith.constant 0 : index
    %c0_51 = arith.constant 0 : index
    %c0_52 = arith.constant 0 : index
    %122 = vector.load %arg11[%c0_50, %c0_51, %c0_52] : memref<2x1x32xf32, #tpu.memory_space<vmem>>, vector<1x1x32xf32>
    %123 = vector.shape_cast %122 : vector<1x1x32xf32> to vector<1x32xf32>
    %124 = vector.broadcast %123 : vector<1x32xf32> to vector<16x32xf32>
    %125 = arith.addf %121, %124 : vector<16x32xf32>
    %126 = arith.addf %95, %125 : vector<16x32xf32>
    %c0_53 = arith.constant 0 : index
    %c0_54 = arith.constant 0 : index
    %c0_55 = arith.constant 0 : index
    %127 = vector.load %arg12[%c0_53, %c0_54, %c0_55] : memref<2x1x32xf32, #tpu.memory_space<vmem>>, vector<1x1x32xf32>
    %128 = vector.shape_cast %127 : vector<1x1x32xf32> to vector<1x32xf32>
    %c0_56 = arith.constant 0 : index
    %c0_57 = arith.constant 0 : index
    %c0_58 = arith.constant 0 : index
    %129 = vector.load %arg13[%c0_56, %c0_57, %c0_58] : memref<2x1x32xf32, #tpu.memory_space<vmem>>, vector<1x1x32xf32>
    %130 = vector.shape_cast %129 : vector<1x1x32xf32> to vector<1x32xf32>
    %cst_59 = arith.constant dense<0.000000e+00> : vector<16xf32>
    %131 = vector.multi_reduction <add>, %126, %cst_59 [1] : vector<16x32xf32> to vector<16xf32>
    %132 = vector.shape_cast %131 : vector<16xf32> to vector<16x1xf32>
    %cst_60 = arith.constant 3.200000e+01 : f32
    %133 = vector.broadcast %cst_60 : f32 to vector<16x1xf32>
    %134 = arith.divf %132, %133 : vector<16x1xf32>
    %135 = vector.broadcast %134 : vector<16x1xf32> to vector<16x32xf32>
    %136 = arith.subf %126, %135 : vector<16x32xf32>
    %137 = arith.mulf %136, %136 : vector<16x32xf32>
    %cst_61 = arith.constant dense<0.000000e+00> : vector<16xf32>
    %138 = vector.multi_reduction <add>, %137, %cst_61 [1] : vector<16x32xf32> to vector<16xf32>
    %139 = vector.shape_cast %138 : vector<16xf32> to vector<16x1xf32>
    %cst_62 = arith.constant 3.200000e+01 : f32
    %140 = vector.broadcast %cst_62 : f32 to vector<16x1xf32>
    %141 = arith.divf %139, %140 : vector<16x1xf32>
    %142 = vector.broadcast %134 : vector<16x1xf32> to vector<16x32xf32>
    %143 = arith.subf %126, %142 : vector<16x32xf32>
    %cst_63 = arith.constant 9.99999996E-13 : f32
    %144 = vector.broadcast %cst_63 : f32 to vector<16x1xf32>
    %145 = arith.addf %141, %144 : vector<16x1xf32>
    %146 = math.rsqrt %145 : vector<16x1xf32>
    %147 = vector.broadcast %146 : vector<16x1xf32> to vector<16x32xf32>
    %148 = arith.mulf %143, %147 : vector<16x32xf32>
    %149 = vector.broadcast %128 : vector<1x32xf32> to vector<16x32xf32>
    %150 = arith.mulf %148, %149 : vector<16x32xf32>
    %151 = vector.broadcast %130 : vector<1x32xf32> to vector<16x32xf32>
    %152 = arith.addf %150, %151 : vector<16x32xf32>
    %153 = arith.truncf %152 : vector<16x32xf32> to vector<16x32xbf16>
    %c1 = arith.constant 1 : index
    %c0_64 = arith.constant 0 : index
    %c0_65 = arith.constant 0 : index
    %154 = vector.load %arg2[%c1, %c0_64, %c0_65] : memref<2x32x96xbf16, #tpu.memory_space<vmem>>, vector<1x32x96xbf16>
    %155 = vector.shape_cast %154 : vector<1x32x96xbf16> to vector<32x96xbf16>
    %cst_66 = arith.constant dense<0.000000e+00> : vector<16x96xf32>
    %156 = tpu.matmul %153, %155, %cst_66 {dimension_numbers = #tpu.dot_dimension_numbers<[1], [0], [0], [1], [0, 0, 1, 1], [], []>} : vector<16x32xbf16>, vector<32x96xbf16>, vector<16x96xf32> -> vector<16x96xf32>
    %c1_67 = arith.constant 1 : index
    %c0_68 = arith.constant 0 : index
    %c0_69 = arith.constant 0 : index
    %157 = vector.load %arg3[%c1_67, %c0_68, %c0_69] : memref<2x1x96xf32, #tpu.memory_space<vmem>>, vector<1x1x96xf32>
    %158 = vector.shape_cast %157 : vector<1x1x96xf32> to vector<1x96xf32>
    %159 = vector.broadcast %158 : vector<1x96xf32> to vector<16x96xf32>
    %160 = arith.addf %156, %159 : vector<16x96xf32>
    %161 = vector.extract_strided_slice %160 {offsets = [0, 0], sizes = [16, 24], strides = [1, 1]} : vector<16x96xf32> to vector<16x24xf32>
    %162 = vector.shape_cast %161 : vector<16x24xf32> to vector<2x8x24xf32>
    %163 = vector.extract_strided_slice %160 {offsets = [0, 24], sizes = [16, 24], strides = [1, 1]} : vector<16x96xf32> to vector<16x24xf32>
    %164 = vector.shape_cast %163 : vector<16x24xf32> to vector<2x8x24xf32>
    %165 = vector.extract_strided_slice %160 {offsets = [0, 48], sizes = [16, 24], strides = [1, 1]} : vector<16x96xf32> to vector<16x24xf32>
    %166 = vector.shape_cast %165 : vector<16x24xf32> to vector<2x8x24xf32>
    %167 = vector.extract_strided_slice %160 {offsets = [0, 72], sizes = [16, 24], strides = [1, 1]} : vector<16x96xf32> to vector<16x24xf32>
    %168 = vector.shape_cast %167 : vector<16x24xf32> to vector<2x8x24xf32>
    %169 = vector.shape_cast %162 : vector<2x8x24xf32> to vector<1x2x8x24xf32>
    %170 = vector.shape_cast %164 : vector<2x8x24xf32> to vector<1x2x8x24xf32>
    %171 = vector.shape_cast %166 : vector<2x8x24xf32> to vector<1x2x8x24xf32>
    %172 = vector.shape_cast %168 : vector<2x8x24xf32> to vector<1x2x8x24xf32>
    %173 = tpu.concatenate %169, %170, %171, %172 in 0 : vector<1x2x8x24xf32>, vector<1x2x8x24xf32>, vector<1x2x8x24xf32>, vector<1x2x8x24xf32> -> vector<4x2x8x24xf32>
    %174 = vector.shape_cast %173 : vector<4x2x8x24xf32> to vector<8x8x24xf32>
    %175 = vector.extract_strided_slice %174 {offsets = [0, 0, 0], sizes = [8, 8, 8], strides = [1, 1, 1]} : vector<8x8x24xf32> to vector<8x8x8xf32>
    %cst_70 = arith.constant 0.353553385 : f32
    %176 = vector.broadcast %cst_70 : f32 to vector<8x8x8xf32>
    %177 = arith.mulf %175, %176 : vector<8x8x8xf32>
    %178 = arith.truncf %177 : vector<8x8x8xf32> to vector<8x8x8xbf16>
    %179 = vector.extract_strided_slice %174 {offsets = [0, 0, 8], sizes = [8, 8, 8], strides = [1, 1, 1]} : vector<8x8x24xf32> to vector<8x8x8xf32>
    %180 = arith.truncf %179 : vector<8x8x8xf32> to vector<8x8x8xbf16>
    %181 = vector.extract_strided_slice %174 {offsets = [0, 0, 16], sizes = [8, 8, 8], strides = [1, 1, 1]} : vector<8x8x24xf32> to vector<8x8x8xf32>
    %182 = arith.truncf %181 : vector<8x8x8xf32> to vector<8x8x8xbf16>
    "tpu.trace_start"() <{level = 10 : i32, message = "bqd,bkd->bqk"}> : () -> ()
    %cst_71 = arith.constant dense<0.000000e+00> : vector<8x8x8xf32>
    %183 = tpu.matmul %178, %180, %cst_71 {dimension_numbers = #tpu.dot_dimension_numbers<[2], [2], [1], [1], [0, 0, 0, 1, 1, 1], [0], [0]>} : vector<8x8x8xbf16>, vector<8x8x8xbf16>, vector<8x8x8xf32> -> vector<8x8x8xf32>
    "tpu.trace_stop"() : () -> ()
    %184 = arith.addf %183, %5 : vector<8x8x8xf32>
    %cst_72 = arith.constant dense<0xFF800000> : vector<8x8xf32>
    %185 = vector.multi_reduction <maximumf>, %184, %cst_72 [2] : vector<8x8x8xf32> to vector<8x8xf32>
    %186 = vector.shape_cast %185 : vector<8x8xf32> to vector<8x8x1xf32>
    %187 = vector.broadcast %186 : vector<8x8x1xf32> to vector<8x8x8xf32>
    %188 = arith.subf %184, %187 : vector<8x8x8xf32>
    %189 = math.exp %188 : vector<8x8x8xf32>
    %cst_73 = arith.constant dense<0.000000e+00> : vector<8x8xf32>
    %190 = vector.multi_reduction <add>, %189, %cst_73 [2] : vector<8x8x8xf32> to vector<8x8xf32>
    %191 = vector.shape_cast %190 : vector<8x8xf32> to vector<8x8x1xf32>
    %192 = tpu.reciprocal %191 {approx = true} : vector<8x8x1xf32> -> vector<8x8x1xf32>
    %193 = vector.broadcast %192 : vector<8x8x1xf32> to vector<8x8x8xf32>
    %194 = arith.mulf %189, %193 : vector<8x8x8xf32>
    %195 = arith.truncf %194 : vector<8x8x8xf32> to vector<8x8x8xbf16>
    "tpu.trace_start"() <{level = 10 : i32, message = "bqk,bkd->bqd"}> : () -> ()
    %cst_74 = arith.constant dense<0.000000e+00> : vector<8x8x8xf32>
    %196 = tpu.matmul %195, %182, %cst_74 {dimension_numbers = #tpu.dot_dimension_numbers<[2], [1], [1], [2], [0, 0, 0, 1, 1, 2], [0], [0]>} : vector<8x8x8xbf16>, vector<8x8x8xbf16>, vector<8x8x8xf32> -> vector<8x8x8xf32>
    "tpu.trace_stop"() : () -> ()
    %197 = vector.shape_cast %196 : vector<8x8x8xf32> to vector<4x2x8x8xf32>
    %198 = vector.extract_strided_slice %197 {offsets = [0, 0, 0, 0], sizes = [1, 2, 8, 8], strides = [1, 1, 1, 1]} : vector<4x2x8x8xf32> to vector<1x2x8x8xf32>
    %199 = vector.shape_cast %198 : vector<1x2x8x8xf32> to vector<2x8x8xf32>
    %200 = vector.extract_strided_slice %197 {offsets = [1, 0, 0, 0], sizes = [1, 2, 8, 8], strides = [1, 1, 1, 1]} : vector<4x2x8x8xf32> to vector<1x2x8x8xf32>
    %201 = vector.shape_cast %200 : vector<1x2x8x8xf32> to vector<2x8x8xf32>
    %202 = vector.extract_strided_slice %197 {offsets = [2, 0, 0, 0], sizes = [1, 2, 8, 8], strides = [1, 1, 1, 1]} : vector<4x2x8x8xf32> to vector<1x2x8x8xf32>
    %203 = vector.shape_cast %202 : vector<1x2x8x8xf32> to vector<2x8x8xf32>
    %204 = vector.extract_strided_slice %197 {offsets = [3, 0, 0, 0], sizes = [1, 2, 8, 8], strides = [1, 1, 1, 1]} : vector<4x2x8x8xf32> to vector<1x2x8x8xf32>
    %205 = vector.shape_cast %204 : vector<1x2x8x8xf32> to vector<2x8x8xf32>
    %206 = tpu.concatenate %199, %201, %203, %205 in 2 : vector<2x8x8xf32>, vector<2x8x8xf32>, vector<2x8x8xf32>, vector<2x8x8xf32> -> vector<2x8x32xf32>
    %207 = vector.shape_cast %206 : vector<2x8x32xf32> to vector<16x32xf32>
    %208 = arith.truncf %207 : vector<16x32xf32> to vector<16x32xbf16>
    %c1_75 = arith.constant 1 : index
    %c0_76 = arith.constant 0 : index
    %c0_77 = arith.constant 0 : index
    %209 = vector.load %arg4[%c1_75, %c0_76, %c0_77] : memref<2x32x32xbf16, #tpu.memory_space<vmem>>, vector<1x32x32xbf16>
    %210 = vector.shape_cast %209 : vector<1x32x32xbf16> to vector<32x32xbf16>
    %cst_78 = arith.constant dense<0.000000e+00> : vector<16x32xf32>
    %211 = tpu.matmul %208, %210, %cst_78 {dimension_numbers = #tpu.dot_dimension_numbers<[1], [0], [0], [1], [0, 0, 1, 1], [], []>} : vector<16x32xbf16>, vector<32x32xbf16>, vector<16x32xf32> -> vector<16x32xf32>
    %c1_79 = arith.constant 1 : index
    %c0_80 = arith.constant 0 : index
    %c0_81 = arith.constant 0 : index
    %212 = vector.load %arg5[%c1_79, %c0_80, %c0_81] : memref<2x1x32xf32, #tpu.memory_space<vmem>>, vector<1x1x32xf32>
    %213 = vector.shape_cast %212 : vector<1x1x32xf32> to vector<1x32xf32>
    %214 = vector.broadcast %213 : vector<1x32xf32> to vector<16x32xf32>
    %215 = arith.addf %211, %214 : vector<16x32xf32>
    %216 = arith.addf %152, %215 : vector<16x32xf32>
    %c1_82 = arith.constant 1 : index
    %c0_83 = arith.constant 0 : index
    %c0_84 = arith.constant 0 : index
    %217 = vector.load %arg6[%c1_82, %c0_83, %c0_84] : memref<2x1x32xf32, #tpu.memory_space<vmem>>, vector<1x1x32xf32>
    %218 = vector.shape_cast %217 : vector<1x1x32xf32> to vector<1x32xf32>
    %c1_85 = arith.constant 1 : index
    %c0_86 = arith.constant 0 : index
    %c0_87 = arith.constant 0 : index
    %219 = vector.load %arg7[%c1_85, %c0_86, %c0_87] : memref<2x1x32xf32, #tpu.memory_space<vmem>>, vector<1x1x32xf32>
    %220 = vector.shape_cast %219 : vector<1x1x32xf32> to vector<1x32xf32>
    %cst_88 = arith.constant dense<0.000000e+00> : vector<16xf32>
    %221 = vector.multi_reduction <add>, %216, %cst_88 [1] : vector<16x32xf32> to vector<16xf32>
    %222 = vector.shape_cast %221 : vector<16xf32> to vector<16x1xf32>
    %cst_89 = arith.constant 3.200000e+01 : f32
    %223 = vector.broadcast %cst_89 : f32 to vector<16x1xf32>
    %224 = arith.divf %222, %223 : vector<16x1xf32>
    %225 = vector.broadcast %224 : vector<16x1xf32> to vector<16x32xf32>
    %226 = arith.subf %216, %225 : vector<16x32xf32>
    %227 = arith.mulf %226, %226 : vector<16x32xf32>
    %cst_90 = arith.constant dense<0.000000e+00> : vector<16xf32>
    %228 = vector.multi_reduction <add>, %227, %cst_90 [1] : vector<16x32xf32> to vector<16xf32>
    %229 = vector.shape_cast %228 : vector<16xf32> to vector<16x1xf32>
    %cst_91 = arith.constant 3.200000e+01 : f32
    %230 = vector.broadcast %cst_91 : f32 to vector<16x1xf32>
    %231 = arith.divf %229, %230 : vector<16x1xf32>
    %232 = vector.broadcast %224 : vector<16x1xf32> to vector<16x32xf32>
    %233 = arith.subf %216, %232 : vector<16x32xf32>
    %cst_92 = arith.constant 9.99999996E-13 : f32
    %234 = vector.broadcast %cst_92 : f32 to vector<16x1xf32>
    %235 = arith.addf %231, %234 : vector<16x1xf32>
    %236 = math.rsqrt %235 : vector<16x1xf32>
    %237 = vector.broadcast %236 : vector<16x1xf32> to vector<16x32xf32>
    %238 = arith.mulf %233, %237 : vector<16x32xf32>
    %239 = vector.broadcast %218 : vector<1x32xf32> to vector<16x32xf32>
    %240 = arith.mulf %238, %239 : vector<16x32xf32>
    %241 = vector.broadcast %220 : vector<1x32xf32> to vector<16x32xf32>
    %242 = arith.addf %240, %241 : vector<16x32xf32>
    %243 = arith.truncf %242 : vector<16x32xf32> to vector<16x32xbf16>
    %c1_93 = arith.constant 1 : index
    %c0_94 = arith.constant 0 : index
    %c0_95 = arith.constant 0 : index
    %244 = vector.load %arg8[%c1_93, %c0_94, %c0_95] : memref<2x32x64xbf16, #tpu.memory_space<vmem>>, vector<1x32x64xbf16>
    %245 = vector.shape_cast %244 : vector<1x32x64xbf16> to vector<32x64xbf16>
    %cst_96 = arith.constant dense<0.000000e+00> : vector<16x64xf32>
    %246 = tpu.matmul %243, %245, %cst_96 {dimension_numbers = #tpu.dot_dimension_numbers<[1], [0], [0], [1], [0, 0, 1, 1], [], []>} : vector<16x32xbf16>, vector<32x64xbf16>, vector<16x64xf32> -> vector<16x64xf32>
    %c1_97 = arith.constant 1 : index
    %c0_98 = arith.constant 0 : index
    %c0_99 = arith.constant 0 : index
    %247 = vector.load %arg9[%c1_97, %c0_98, %c0_99] : memref<2x1x64xf32, #tpu.memory_space<vmem>>, vector<1x1x64xf32>
    %248 = vector.shape_cast %247 : vector<1x1x64xf32> to vector<1x64xf32>
    %249 = vector.broadcast %248 : vector<1x64xf32> to vector<16x64xf32>
    %250 = arith.addf %246, %249 : vector<16x64xf32>
    %cst_100 = arith.constant 0.636619746 : f32
    %251 = math.sqrt %cst_100 : f32
    %cst_101 = arith.constant 5.000000e-01 : f32
    %252 = vector.broadcast %cst_101 : f32 to vector<16x64xf32>
    %253 = arith.mulf %252, %250 : vector<16x64xf32>
    %cst_102 = arith.constant 4.471500e-02 : f32
    %254 = vector.broadcast %cst_102 : f32 to vector<16x64xf32>
    %255 = arith.mulf %254, %250 : vector<16x64xf32>
    %256 = arith.mulf %255, %250 : vector<16x64xf32>
    %257 = arith.mulf %256, %250 : vector<16x64xf32>
    %258 = arith.addf %250, %257 : vector<16x64xf32>
    %259 = vector.broadcast %251 : f32 to vector<16x64xf32>
    %260 = arith.mulf %259, %258 : vector<16x64xf32>
    %261 = math.tanh %260 : vector<16x64xf32>
    %cst_103 = arith.constant 1.000000e+00 : f32
    %262 = vector.broadcast %cst_103 : f32 to vector<16x64xf32>
    %263 = arith.addf %262, %261 : vector<16x64xf32>
    %264 = arith.mulf %253, %263 : vector<16x64xf32>
    %265 = arith.truncf %264 : vector<16x64xf32> to vector<16x64xbf16>
    %c1_104 = arith.constant 1 : index
    %c0_105 = arith.constant 0 : index
    %c0_106 = arith.constant 0 : index
    %266 = vector.load %arg10[%c1_104, %c0_105, %c0_106] : memref<2x64x32xbf16, #tpu.memory_space<vmem>>, vector<1x64x32xbf16>
    %267 = vector.shape_cast %266 : vector<1x64x32xbf16> to vector<64x32xbf16>
    %cst_107 = arith.constant dense<0.000000e+00> : vector<16x32xf32>
    %268 = tpu.matmul %265, %267, %cst_107 {dimension_numbers = #tpu.dot_dimension_numbers<[1], [0], [0], [1], [0, 0, 1, 1], [], []>} : vector<16x64xbf16>, vector<64x32xbf16>, vector<16x32xf32> -> vector<16x32xf32>
    %c1_108 = arith.constant 1 : index
    %c0_109 = arith.constant 0 : index
    %c0_110 = arith.constant 0 : index
    %269 = vector.load %arg11[%c1_108, %c0_109, %c0_110] : memref<2x1x32xf32, #tpu.memory_space<vmem>>, vector<1x1x32xf32>
    %270 = vector.shape_cast %269 : vector<1x1x32xf32> to vector<1x32xf32>
    %271 = vector.broadcast %270 : vector<1x32xf32> to vector<16x32xf32>
    %272 = arith.addf %268, %271 : vector<16x32xf32>
    %273 = arith.addf %242, %272 : vector<16x32xf32>
    %c1_111 = arith.constant 1 : index
    %c0_112 = arith.constant 0 : index
    %c0_113 = arith.constant 0 : index
    %274 = vector.load %arg12[%c1_111, %c0_112, %c0_113] : memref<2x1x32xf32, #tpu.memory_space<vmem>>, vector<1x1x32xf32>
    %275 = vector.shape_cast %274 : vector<1x1x32xf32> to vector<1x32xf32>
    %c1_114 = arith.constant 1 : index
    %c0_115 = arith.constant 0 : index
    %c0_116 = arith.constant 0 : index
    %276 = vector.load %arg13[%c1_114, %c0_115, %c0_116] : memref<2x1x32xf32, #tpu.memory_space<vmem>>, vector<1x1x32xf32>
    %277 = vector.shape_cast %276 : vector<1x1x32xf32> to vector<1x32xf32>
    %cst_117 = arith.constant dense<0.000000e+00> : vector<16xf32>
    %278 = vector.multi_reduction <add>, %273, %cst_117 [1] : vector<16x32xf32> to vector<16xf32>
    %279 = vector.shape_cast %278 : vector<16xf32> to vector<16x1xf32>
    %cst_118 = arith.constant 3.200000e+01 : f32
    %280 = vector.broadcast %cst_118 : f32 to vector<16x1xf32>
    %281 = arith.divf %279, %280 : vector<16x1xf32>
    %282 = vector.broadcast %281 : vector<16x1xf32> to vector<16x32xf32>
    %283 = arith.subf %273, %282 : vector<16x32xf32>
    %284 = arith.mulf %283, %283 : vector<16x32xf32>
    %cst_119 = arith.constant dense<0.000000e+00> : vector<16xf32>
    %285 = vector.multi_reduction <add>, %284, %cst_119 [1] : vector<16x32xf32> to vector<16xf32>
    %286 = vector.shape_cast %285 : vector<16xf32> to vector<16x1xf32>
    %cst_120 = arith.constant 3.200000e+01 : f32
    %287 = vector.broadcast %cst_120 : f32 to vector<16x1xf32>
    %288 = arith.divf %286, %287 : vector<16x1xf32>
    %289 = vector.broadcast %281 : vector<16x1xf32> to vector<16x32xf32>
    %290 = arith.subf %273, %289 : vector<16x32xf32>
    %cst_121 = arith.constant 9.99999996E-13 : f32
    %291 = vector.broadcast %cst_121 : f32 to vector<16x1xf32>
    %292 = arith.addf %288, %291 : vector<16x1xf32>
    %293 = math.rsqrt %292 : vector<16x1xf32>
    %294 = vector.broadcast %293 : vector<16x1xf32> to vector<16x32xf32>
    %295 = arith.mulf %290, %294 : vector<16x32xf32>
    %296 = vector.broadcast %275 : vector<1x32xf32> to vector<16x32xf32>
    %297 = arith.mulf %295, %296 : vector<16x32xf32>
    %298 = vector.broadcast %277 : vector<1x32xf32> to vector<16x32xf32>
    %299 = arith.addf %297, %298 : vector<16x32xf32>
    %300 = vector.shape_cast %299 : vector<16x32xf32> to vector<2x8x32xf32>
    %301 = vector.extract_strided_slice %300 {offsets = [0, 0, 0], sizes = [2, 1, 32], strides = [1, 1, 1]} : vector<2x8x32xf32> to vector<2x1x32xf32>
    %302 = vector.shape_cast %301 : vector<2x1x32xf32> to vector<2x32xf32>
    %303 = arith.truncf %302 : vector<2x32xf32> to vector<2x32xbf16>
    %c0_122 = arith.constant 0 : index
    %c0_123 = arith.constant 0 : index
    %304 = vector.load %arg14[%c0_122, %c0_123] : memref<32x32xbf16, #tpu.memory_space<vmem>>, vector<32x32xbf16>
    %cst_124 = arith.constant dense<0.000000e+00> : vector<2x32xf32>
    %305 = tpu.matmul %303, %304, %cst_124 {dimension_numbers = #tpu.dot_dimension_numbers<[1], [0], [0], [1], [0, 0, 1, 1], [], []>} : vector<2x32xbf16>, vector<32x32xbf16>, vector<2x32xf32> -> vector<2x32xf32>
    %c0_125 = arith.constant 0 : index
    %c0_126 = arith.constant 0 : index
    %306 = vector.load %arg15[%c0_125, %c0_126] : memref<1x32xf32, #tpu.memory_space<vmem>>, vector<1x32xf32>
    %307 = vector.broadcast %306 : vector<1x32xf32> to vector<2x32xf32>
    %308 = arith.addf %305, %307 : vector<2x32xf32>
    %309 = math.tanh %308 : vector<2x32xf32>
    %310 = arith.truncf %309 : vector<2x32xf32> to vector<2x32xbf16>
    %c0_127 = arith.constant 0 : index
    %c0_128 = arith.constant 0 : index
    %311 = vector.load %arg16[%c0_127, %c0_128] : memref<32x128xbf16, #tpu.memory_space<vmem>>, vector<32x128xbf16>
    %cst_129 = arith.constant dense<0.000000e+00> : vector<2x128xf32>
    %312 = tpu.matmul %310, %311, %cst_129 {dimension_numbers = #tpu.dot_dimension_numbers<[1], [0], [0], [1], [0, 0, 1, 1], [], []>} : vector<2x32xbf16>, vector<32x128xbf16>, vector<2x128xf32> -> vector<2x128xf32>
    %c0_130 = arith.constant 0 : index
    %c0_131 = arith.constant 0 : index
    %313 = vector.load %arg17[%c0_130, %c0_131] : memref<1x128xf32, #tpu.memory_space<vmem>>, vector<1x128xf32>
    %314 = vector.broadcast %313 : vector<1x128xf32> to vector<2x128xf32>
    %315 = arith.addf %312, %314 : vector<2x128xf32>
    %c0_132 = arith.constant 0 : index
    %c0_133 = arith.constant 0 : index
    %316 = vector.load %arg18[%c0_132, %c0_133] : memref<2x128xf32, #tpu.memory_space<vmem>>, vector<2x128xf32>
    tpu.vector_store %arg18[%c0_132, %c0_133], %315 {strides = array<i32>} : memref<2x128xf32, #tpu.memory_space<vmem>>, vector<2x128xf32>,
    return
  }
}

</mosaic_0001>

<bundles_post_ra>
// kernel: model_forward.1
= control target key start
LH: loop header
LB: loop body
LE: loop exit
PB: predicated region body
PF: predicated region fallthrough
CT: control target
= control target key end

     0   :  { %s3178_s0 = inlined_call_operand.hbm [shape: f32[2,8,32], index: 0, kind: input, shape index: {}]   ;;  %s3179_s1 = inlined_call_operand.hbm [shape: f32[1,2,1,8], index: 1, kind: input, shape index: {}]   ;;  %s3180_s2 = inlined_call_operand.vmem [shape: bf16[2,32,96], index: 2, kind: input, shape index: {}]   ;;  %s3181_s3 = inlined_call_operand.vmem [shape: f32[2,1,96], index: 3, kind: input, shape index: {}]   ;;  %s3182_s4 = inlined_call_operand.vmem [shape: bf16[2,32,32], index: 4, kind: input, shape index: {}]   ;;  %s3183_s5 = inlined_call_operand.vmem [shape: f32[2,1,32], index: 5, kind: input, shape index: {}]   ;;  %s3184_s6 = inlined_call_operand.vmem [shape: f32[2,1,32], index: 6, kind: input, shape index: {}]   ;;  %s3185_s7 = inlined_call_operand.hbm [shape: f32[2,1,32], index: 7, kind: input, shape index: {}]   ;;  %s3186_s8 = inlined_call_operand.vmem [shape: bf16[2,32,64], index: 8, kind: input, shape index: {}]   ;;  %s3187_s9 = inlined_call_operand.hbm [shape: f32[2,1,64], index: 9, kind: input, shape index: {}]   ;;  %s3188_s10 = inlined_call_operand.vmem [shape: bf16[2,64,32], index: 10, kind: input, shape index: {}]   ;;  %s3189_s11 = inlined_call_operand.hbm [shape: f32[2,1,32], index: 11, kind: input, shape index: {}]   ;;  %s3190_s12 = inlined_call_operand.vmem [shape: f32[2,1,32], index: 12, kind: input, shape index: {}]   ;;  %s3191_s13 = inlined_call_operand.hbm [shape: f32[2,1,32], index: 13, kind: input, shape index: {}]   ;;  %s3192_s14 = inlined_call_operand.hbm [shape: bf16[32,32], index: 14, kind: input, shape index: {}]   ;;  %s3193_s15 = inlined_call_operand.vmem [shape: f32[1,32], index: 15, kind: input, shape index: {}]   ;;  %s3194_s16 = inlined_call_operand.hbm [shape: bf16[32,128], index: 16, kind: input, shape index: {}]   ;;  %s3195_s17 = inlined_call_operand.hbm [shape: f32[1,128], index: 17, kind: input, shape index: {}]   ;;  %s3196_s18 = inlined_call_operand.hbm [shape: f32[2,128], index: 18, kind: output, shape index: {}]  }
   0x1   :  { %3200 = sst [smem:[#allocation24_spill]] %s3178_s0 }
   0x2   :  { %3201 = sst [smem:[#allocation25_spill]] %s3179_s1 }
   0x3   :  { %3202 = sst [smem:[#allocation26_spill]] %s3180_s2 }
   0x4   :  { %23 = vsyncpa [#allocation3], 0 }
   0x5   :  { %24 = vsyncpa [#allocation6], 0 }
   0x6   :  { %25 = vsyncpa [#allocation9], 0 }
   0x7   :  { %26 = vsyncpa [#allocation12], 0 }
   0x8   :  { %27 = vsyncpa [#allocation15], 0  ;;  %s3203_s29 = sld [smem:[#allocation25_spill]] }
   0xe   :  { %s46_s30 = sshll.u32 %s3203_s29, 4  ;;  %s47_s30 = int_to_ptr.hbm [resolvable:$true] %s46_s30 }
   0xf   :  { %28 = vsyncpa [#allocation4], 0  ;;  %s2609_s0 = smov [#allocation5]   ;;  %s84_s21 = sshll.u32 %s3187_s9, 4  ;;  %s85_s21 = int_to_ptr.hbm [resolvable:$true] %s84_s21 }
  0x10   :  { %s48_s19 = sshll.u32 %s2609_s0, 4  ;;  %s3198_s22 = smov 16   ;;  %s49_s19 = int_to_ptr.vmem [resolvable:$true] %s48_s19 }
  0x11   :  { %s2611_s2 = smov 1   ;;  %s2612_s23 = smov [#allocation8]  }
  0x12   :  { %54 = dma.hbm_to_vmem [thread:$0]  %s47_s30, 32, %s49_s19, [#allocation6], %s3198_s22, %s3198_s22, %s2611_s2  }
  0x13   :  { %s86_s24 = sshll.u32 %s2612_s23, 4  ;;  %s114_s27 = sshll.u32 %s3191_s13, 4  ;;  %s87_s24 = int_to_ptr.vmem [resolvable:$true] %s86_s24  ;;  %s115_s27 = int_to_ptr.hbm [resolvable:$true] %s114_s27 }
  0x14   :  { %92 = dma.hbm_to_vmem [thread:$0]  %s85_s21, 32, %s87_s24, [#allocation9], %s3198_s22, %s3198_s22, %s2611_s2  }
  0x15   :  { %s2613_s9 = smov [#allocation11]   ;;  %s142_s30 = sshll.u32 %s3194_s16, 4  ;;  %s143_s30 = int_to_ptr.hbm [resolvable:$true] %s142_s30 }
  0x16   :  { %s116_s28 = sshll.u32 %s2613_s9, 4  ;;  %s2614_s19 = smov [#allocation14]   ;;  %s117_s28 = int_to_ptr.vmem [resolvable:$true] %s116_s28 }
  0x17   :  { %122 = dma.hbm_to_vmem [thread:$0]  %s115_s27, 32, %s117_s28, [#allocation12], %s3198_s22, %s3198_s22, %s2611_s2  }
  0x18   :  { %s144_s13 = sshll.u32 %s2614_s19, 4  ;;  %s3204_s23 = sld [smem:[#allocation24_spill]]  ;;  %s145_s13 = int_to_ptr.vmem [resolvable:$true] %s144_s13 }
  0x19   :  { %s2615_s21 = smov 64   ;;  %s2616_s24 = smov 4  }
  0x1a   :  { %150 = dma.hbm_to_vmem [thread:$0]  %s143_s30, 256, %s145_s13, [#allocation15], %s2615_s21, %s2615_s21, %s2616_s24  }
  0x1b   :  { %s2617_s16 = smov [#allocation2]   ;;  %s69_s28 = sshll.u32 %s3185_s7, 4  ;;  %s70_s28 = int_to_ptr.hbm [resolvable:$true] %s69_s28 }
  0x1c   :  { %s35_s26 = sshll.u32 %s2617_s16, 4  ;;  %s2618_s29 = smov 128   ;;  %s36_s26 = int_to_ptr.vmem [resolvable:$true] %s35_s26 }
  0x1d   :  { %s2619_s0 = smov 8   ;;  %s2620_s19 = smov [#allocation7]  }
  0x1e   :  { %s33_s25 = sshll.u32 %s3204_s23, 4  ;;  %s71_s1 = sshll.u32 %s2620_s19, 4  ;;  %s34_s25 = int_to_ptr.hbm [resolvable:$true] %s33_s25  ;;  %s72_s1 = int_to_ptr.vmem [resolvable:$true] %s71_s1 }
  0x1f   :  { %41 = dma.hbm_to_vmem [thread:$0]  %s34_s25, 256, %s36_s26, [#allocation3], %s2618_s29, %s2618_s29, %s2619_s0  }
  0x20   :  { %s99_s22 = sshll.u32 %s3189_s11, 4  ;;  %s3205_s30 = smov 16   ;;  %s100_s22 = int_to_ptr.hbm [resolvable:$true] %s99_s22 }
  0x21   :  { %77 = dma.hbm_to_vmem [thread:$0]  %s70_s28, 32, %s72_s1, [#allocation6], %s3205_s30, %s3205_s30, %s2611_s2  }
  0x22   :  { %s127_s7 = sshll.u32 %s3192_s14, 4  ;;  %s2621_s9 = smov [#allocation10]   ;;  %s128_s7 = int_to_ptr.hbm [resolvable:$true] %s127_s7 }
  0x23   :  { %s101_s27 = sshll.u32 %s2621_s9, 4  ;;  %s2622_s25 = smov [#allocation13]   ;;  %s102_s27 = int_to_ptr.vmem [resolvable:$true] %s101_s27 }
  0x24   :  { %107 = dma.hbm_to_vmem [thread:$0]  %s100_s22, 32, %s102_s27, [#allocation9], %s3205_s30, %s3205_s30, %s2611_s2  }
  0x25   :  { %s129_s11 = sshll.u32 %s2622_s25, 4  ;;  %s156_s19 = sshll.u32 %s3195_s17, 4  ;;  %s130_s11 = int_to_ptr.vmem [resolvable:$true] %s129_s11  ;;  %s157_s19 = int_to_ptr.hbm [resolvable:$true] %s156_s19 }
  0x26   :  { %135 = dma.hbm_to_vmem [thread:$0]  %s128_s7, 256, %s130_s11, [#allocation12], %s2615_s21, %s2615_s21, %s2616_s24  }
  0x27   :  { %s2623_s14 = smov [#allocation16]  }
  0x28   :  { %s158_s28 = sshll.u32 %s2623_s14, 4  ;;  %s159_s28 = int_to_ptr.vmem [resolvable:$true] %s158_s28 }
  0x29   :  { %161 = dma.hbm_to_vmem [thread:$0]  %s157_s19, 16, %s159_s28, [#allocation15]  }
  0x2a   :  { %2597 = dma.done.wait [#allocation3], 256  }
  0x2b   :  { %2598 = vsyncadd [#allocation3], 4294967040 }
  0x2c   :  { %2599 = dma.done.wait [#allocation6], 64  }
  0x2d   :  { %2600 = vsyncadd [#allocation6], 4294967232 }
  0x2e   :  { %2601 = dma.done.wait [#allocation9], 64  }
  0x2f   :  { %2602 = vsyncadd [#allocation9], 4294967232 }
  0x30   :  { %2603 = dma.done.wait [#allocation12], 288  }
  0x31   :  { %2604 = vsyncadd [#allocation12], 4294967008 }
  0x32   :  { %2605 = dma.done.wait [#allocation15], 272  }
  0x33   :  { %2606 = vsyncadd [#allocation15], 4294967024  ;;  %s3206_s2 = sld [smem:[#allocation26_spill]]  ;;  %v2782_v2 = vld [vmem:[#allocation2] sm:$0xff]  ;;  %v2784_v3 = vld [vmem:[#allocation2 + $0x8] sm:$0xff]  ;;  %vm230_vm0 = vcmask 261120  }
  0x34   :  { %v209_v4 = vpack.c.bf16 %v2784_v3, %v2782_v2  ;;  %v2243_v5 = vld [vmem:[%s3181_s3] ss:$0 sm:$0xff]  ;;  %s2624_s23 = smov 80   ;;  %s2625_s13 = smov 104   ;;  %vm297_vm1 = vcmask 64512   ;;  %vm586_vm2 = vcmask 1043456  }
  0x35   :  { %s2626_s16 = smov 56   ;;  %s2627_s7 = smov 120   ;;  %v2838_v52 = vld [vmem:[#allocation5] ss:$0 sm:$0xff]  ;;  %vm776_vm3 = vcmask 130048   ;;  %vm779_vm4 = vcmask 195584  }
  0x36   :  { %s2628_s9 = smov 112   ;;  %s2629_s27 = smov 24   ;;  %vm978_vm12 = vcmask 523264  }
  0x37   :  { %s2631_s24 = smov [#allocation17]   ;;  %s1990_s25 = sshll.u32 %s3196_s18, 4  ;;  %s1991_s25 = int_to_ptr.hbm [resolvable:$true] %s1990_s25 }
  0x39   :  { %v2167_v0 = vld [vmem:[%s3206_s2 + $0x8] sm:$0xff]  ;;  %v2166_v1 = vld [vmem:[%s3206_s2] sm:$0xff] }
  0x3a   :  { %240 = vmatpush.bf16.msra.mxu0 %v2167_v0 }
  0x3e   :  { %241 = vmatpush.bf16.msra.mxu0 %v2166_v1 }
  0x41   :  { %2012 = vmatmul.msk.bf16.vlgmr.msra.gmra.mxu0 %vm230_vm0, %v209_v4 }
  0xbe   :  { %v243_v6 = vpop.f32.mrf.mxu0 }
  0xbf   :  { %v244_v7 = vadd.f32 %v2243_v5, %v243_v6 }
  0xc1   :  { %256 = vrot.lane.b32.xlu2 %v244_v7, %s2624_s23  ;;  %250 = vrot.lane.b32.xlu0 %v244_v7, %s2625_s13  ;;  %v284_v10 = vpack.c.bf16 %v244_v7, %v244_v7  ;;  %v268_v20 = vmul.f32 0.35355338, %v244_v7 }
  0xc3   :  { %v293_v12 = vunpack.c.l.b16 %v284_v10  ;;  %v276_v21 = vpack.c.bf16 %v268_v20, %v268_v20 }
  0xc5   :  { %v294_v14 = vpack.c.b16 %v293_v12, %v293_v12 }
  0xc6   :  { %v245_v8 = vpop.f32.mrf.mxu0 }
  0xc7   :  { %v246_v9 = vadd.f32 %v2243_v5, %v245_v8 }
  0xc9   :  { %258 = vrot.lane.b32.xlu1 %v246_v9, %s2624_s23  ;;  %264 = vrot.lane.b32.xlu2 %v246_v9, %s2626_s16  ;;  %v285_v11 = vpack.c.bf16 %v246_v9, %v246_v9  ;;  %v269_v43 = vmul.f32 0.35355338, %v246_v9 }
  0xca   :  { %252 = vrot.lane.b32.xlu0 %v246_v9, %s2625_s13 }
  0xcb   :  { %v318_v13 = vunpack.c.l.b16 %v285_v11  ;;  %v277_v47 = vpack.c.bf16 %v269_v43, %v269_v43 }
  0xcd   :  { %v319_v15 = vpack.c.b16 %v318_v13, %v318_v13 }
  0xd1   :  { %262 = vrot.lane.b32.xlu1 %v244_v7, %s2626_s16  ;;  %295 = vrot.lane.b32.xlu2 %v294_v14, %s2627_s7 }
  0xd2   :  { %320 = vrot.lane.b32.xlu0 %v319_v15, %s2627_s7 }
 0x11b   :  { %v2800_v16 = vpop.permute.xlu2 %256 }
 0x11c   :  { %v288_v34 = vpack.c.bf16 %v2800_v16, %v2800_v16  ;;  %v272_v12 = vmul.f32 0.35355338, %v2800_v16 }
 0x11e   :  { %v390_v40 = vunpack.c.l.b16 %v288_v34 }
 0x120   :  { %v2824_v46 = vpack.c.b16 %v390_v40, %v390_v40 }
 0x123   :  { %v2802_v17 = vpop.permute.xlu2 %264 }
 0x124   :  { %v291_v32 = vpack.c.bf16 %v2802_v17, %v2802_v17 }
 0x126   :  { %v462_v37 = vunpack.c.l.b16 %v291_v32 }
 0x128   :  { %v2820_v44 = vpack.c.b16 %v462_v37, %v462_v37 }
 0x12b   :  { %v296_v18 = vpop.permute.xlu2 %295 }
 0x12c   :  { %v302_v19 = vsel %vm297_vm1, %v296_v18, 0 }
 0x12d   :  { %311 = vmatpush.bf16.xpose.msra.mxu1 %v302_v19 }
 0x133   :  { %v251_v22 = vpop.permute.xlu0 %250 }
 0x134   :  { %v286_v23 = vpack.c.bf16 %v251_v22, %v251_v22  ;;  %2013 = vmatmul.msk.bf16.vlgmr.msra.gmra.mxu1 %vm297_vm1, %v276_v21  ;;  %v270_v53 = vmul.f32 0.35355338, %v251_v22  ;;  %v275_v21 = vmul.f32 0.35355338, %v2802_v17 }
 0x136   :  { %v342_v24 = vunpack.c.l.b16 %v286_v23  ;;  %v278_v57 = vpack.c.bf16 %v270_v53, %v270_v53  ;;  %v283_v22 = vpack.c.bf16 %v275_v21, %v275_v21  ;;  %v2856_v23 = vld [vmem:[#allocation5 + $0x1] ss:$0 sm:$0xff] }
 0x138   :  { %v343_v25 = vpack.c.b16 %v342_v24, %v342_v24 }
 0x13a   :  { %344 = vrot.lane.b32.xlu1 %v343_v25, %s2627_s7 }
 0x13b   :  { %v259_v26 = vpop.permute.xlu1 %258 }
 0x13c   :  { %v289_v27 = vpack.c.bf16 %v259_v26, %v259_v26  ;;  %v253_v28 = vpop.permute.xlu0 %252  ;;  %v273_v0 = vmul.f32 0.35355338, %v259_v26 }
 0x13d   :  { %v287_v29 = vpack.c.bf16 %v253_v28, %v253_v28  ;;  %v271_v1 = vmul.f32 0.35355338, %v253_v28 }
 0x13e   :  { %v414_v30 = vunpack.c.l.b16 %v289_v27  ;;  %v281_v5 = vpack.c.bf16 %v273_v0, %v273_v0 }
 0x13f   :  { %v366_v31 = vunpack.c.l.b16 %v287_v29  ;;  %v279_v6 = vpack.c.bf16 %v271_v1, %v271_v1 }
 0x140   :  { %v2809_v33 = vpack.c.b16 %v414_v30, %v414_v30 }
 0x141   :  { %v2813_v35 = vpack.c.b16 %v366_v31, %v366_v31 }
 0x142   :  { %416 = vrot.lane.b32.xlu1 %v2809_v33, %s2627_s7 }
 0x143   :  { %368 = vrot.lane.b32.xlu0 %v2813_v35, %s2627_s7  ;;  %v263_v36 = vpop.permute.xlu1 %262 }
 0x144   :  { %v290_v38 = vpack.c.bf16 %v263_v36, %v263_v36  ;;  %v321_v39 = vpop.permute.xlu0 %320  ;;  %v274_v11 = vmul.f32 0.35355338, %v263_v36 }
 0x145   :  { %v326_v41 = vsel %vm297_vm1, %v321_v39, 0 }
 0x146   :  { %v438_v42 = vunpack.c.l.b16 %v290_v38  ;;  %335 = vmatpush.bf16.xpose.msra.mxu2 %v326_v41  ;;  %v282_v13 = vpack.c.bf16 %v274_v11, %v274_v11 }
 0x148   :  { %v2822_v45 = vpack.c.b16 %v438_v42, %v438_v42 }
 0x14a   :  { %464 = vrot.lane.b32.xlu1 %v2820_v44, %s2627_s7  ;;  %440 = vrot.lane.b32.xlu2 %v2822_v45, %s2627_s7 }
 0x14b   :  { %392 = vrot.lane.b32.xlu0 %v2824_v46, %s2627_s7 }
 0x14d   :  { %2014 = vmatmul.msk.bf16.vlgmr.msra.gmra.mxu2 %vm297_vm1, %v277_v47 }
 0x152   :  { %603 = vrot.lane.b32.xlu1 %v319_v15, %s2628_s9  ;;  %624 = vrot.lane.b32.xlu2 %v343_v25, %s2628_s9 }
 0x153   :  { %581 = vrot.lane.b32.xlu0 %v294_v14, %s2628_s9  ;;  %v280_v14 = vpack.c.bf16 %v272_v12, %v272_v12 }
 0x1a4   :  { %v441_v48 = vpop.permute.xlu2 %440 }
 0x1a5   :  { %v446_v51 = vsel %vm297_vm1, %v441_v48, 0 }
 0x1ac   :  { %v345_v49 = vpop.permute.xlu1 %344  ;;  %v625_v55 = vpop.permute.xlu2 %624 }
 0x1ad   :  { %v350_v50 = vsel %vm297_vm1, %v345_v49, 0  ;;  %v630_v60 = vsel %vm586_vm2, %v625_v55, 0 }
 0x1ae   :  { %359 = vmatpush.bf16.xpose.msra.mxu3 %v350_v50 }
 0x1b1   :  { %v313_v54 = vpop.f32.mrf.mxu1 }
 0x1b2   :  { %v314_v56 = vadd.f32 %v2838_v52, %v313_v54 }
 0x1b4   :  { %v417_v58 = vpop.permute.xlu1 %416  ;;  %v485_v59 = vsel %vm297_vm1, %v314_v56, -inf }
 0x1b5   :  { %v369_v61 = vpop.permute.xlu0 %368  ;;  %2015 = vmatmul.msk.bf16.vlgmr.msra.gmra.mxu3 %vm297_vm1, %v278_v57  ;;  %486 = vmax.xlane.f32.xlu1 %v485_v59  ;;  %v422_v62 = vsel %vm297_vm1, %v417_v58, 0 }
 0x1b6   :  { %455 = vmatpush.bf16.xpose.msrb.mxu3 %v446_v51  ;;  %v374_v63 = vsel %vm297_vm1, %v369_v61, 0  ;;  %431 = vmatpush.bf16.xpose.msrb.mxu2 %v422_v62 }
 0x1b7   :  { %383 = vmatpush.bf16.xpose.msrb.mxu0 %v374_v63 }
 0x1b9   :  { %v315_v4 = vpop.f32.mrf.mxu1 }
 0x1bc   :  { %v465_v7 = vpop.permute.xlu1 %464 }
 0x1bd   :  { %v470_v8 = vsel %vm297_vm1, %v465_v7, 0  ;;  %v393_v9 = vpop.permute.xlu0 %392  ;;  %2018 = vmatmul.msk.bf16.vlgmr.msrb.gmra.mxu2 %vm297_vm1, %v281_v5 }
 0x1be   :  { %639 = vmatpush.bf16.msra.mxu3 %v630_v60  ;;  %2016 = vmatmul.msk.bf16.vlgmr.msrb.gmra.mxu0 %vm297_vm1, %v279_v6  ;;  %v398_v10 = vsel %vm297_vm1, %v393_v9, 0 }
 0x1bf   :  { %407 = vmatpush.bf16.xpose.msrb.mxu1 %v398_v10  ;;  %479 = vmatpush.bf16.xpose.msra.mxu0 %v470_v8 }
 0x1c4   :  { %v604_v15 = vpop.permute.xlu1 %603 }
 0x1c5   :  { %v609_v18 = vsel %vm586_vm2, %v604_v15, 0  ;;  %v582_v19 = vpop.permute.xlu0 %581  ;;  %2019 = vmatmul.msk.bf16.vlgmr.msrb.gmra.mxu3 %vm297_vm1, %v282_v13 }
 0x1c6   :  { %v588_v20 = vsel %vm586_vm2, %v582_v19, 0  ;;  %2017 = vmatmul.msk.bf16.vlgmr.msrb.gmra.mxu1 %vm297_vm1, %v280_v14  ;;  %618 = vmatpush.bf16.msra.mxu2 %v609_v18 }
 0x1c7   :  { %597 = vmatpush.bf16.msra.mxu1 %v588_v20 }
 0x1ce   :  { %2020 = vmatmul.msk.bf16.vlgmr.msra.gmra.mxu0 %vm297_vm1, %v283_v22  ;;  %645 = vrot.lane.b32.xlu1 %v2813_v35, %s2628_s9 }
 0x1d0   :  { %v337_v16 = vpop.f32.mrf.mxu2 }
 0x1d1   :  { %v338_v24 = vadd.f32 %v2856_v23, %v337_v16 }
 0x1d3   :  { %v488_v25 = vsel %vm297_vm1, %v338_v24, -inf }
 0x1d4   :  { %489 = vmax.xlane.f32.xlu2 %v488_v25 }
 0x1d8   :  { %v339_v26 = vpop.f32.mrf.mxu2 }
 0x228   :  { %v487_v27 = vpop.xlane.xlu1 %486 }
 0x229   :  { %v509_v28 = vsub.f32 %v314_v56, %v487_v27 }
 0x22b   :  { %v517_v30 = vmul.f32 1.442695, %v509_v28 }
 0x22d   :  { %2263 = vpow2.f32 %v517_v30 }
 0x233   :  { %v2264_v40 = vpop.eup %2263 }
 0x234   :  { %v533_v48 = vsel %vm297_vm1, %v2264_v40, 0.0 }
 0x238   :  { %v361_v29 = vpop.f32.mrf.mxu3 }
 0x239   :  { %v362_v17 = vadd.f32 %v2838_v52, %v361_v29 }
 0x23b   :  { %v385_v31 = vpop.f32.mrf.mxu0  ;;  %v491_v32 = vsel %vm297_vm1, %v362_v17, -inf }
 0x23c   :  { %v386_v34 = vadd.f32 %v2856_v23, %v385_v31  ;;  %492 = vmax.xlane.f32.xlu0 %v491_v32 }
 0x23e   :  { %v494_v35 = vsel %vm297_vm1, %v386_v34, -inf }
 0x23f   :  { %495 = vmax.xlane.f32.xlu2 %v494_v35 }
 0x240   :  { %v363_v36 = vpop.f32.mrf.mxu3  ;;  %v433_v37 = vpop.f32.mrf.mxu2 }
 0x241   :  { %v646_v38 = vpop.permute.xlu1 %645  ;;  %v434_v55 = vadd.f32 %v2856_v23, %v433_v37 }
 0x242   :  { %v651_v39 = vsel %vm586_vm2, %v646_v38, 0 }
 0x243   :  { %v387_v41 = vpop.f32.mrf.mxu0  ;;  %v409_v42 = vpop.f32.mrf.mxu1  ;;  %660 = vmatpush.bf16.msrb.mxu0 %v651_v39  ;;  %v500_v60 = vsel %vm297_vm1, %v434_v55, -inf }
 0x244   :  { %v410_v43 = vadd.f32 %v2838_v52, %v409_v42 }
 0x246   :  { %v497_v47 = vsel %vm297_vm1, %v410_v43, -inf }
 0x247   :  { %v490_v49 = vpop.xlane.xlu2 %489  ;;  %498 = vmax.xlane.f32.xlu1 %v497_v47  ;;  %534 = vadd.xlane.f32.xlu2 %v533_v48 }
 0x248   :  { %v510_v50 = vsub.f32 %v338_v24, %v490_v49  ;;  %v435_v51 = vpop.f32.mrf.mxu2  ;;  %v457_v53 = vpop.f32.mrf.mxu3 }
 0x249   :  { %v458_v54 = vadd.f32 %v2838_v52, %v457_v53 }
 0x24a   :  { %v519_v56 = vmul.f32 1.442695, %v510_v50 }
 0x24b   :  { %v411_v57 = vpop.f32.mrf.mxu1  ;;  %v481_v58 = vpop.f32.mrf.mxu0  ;;  %v503_v59 = vsel %vm297_vm1, %v458_v54, -inf }
 0x24c   :  { %2265 = vpow2.f32 %v519_v56  ;;  %504 = vmax.xlane.f32.xlu0 %v503_v59  ;;  %v482_v63 = vadd.f32 %v2856_v23, %v481_v58 }
 0x24e   :  { %v506_v52 = vsel %vm297_vm1, %v482_v63, -inf }
 0x24f   :  { %501 = vmax.xlane.f32.xlu2 %v500_v60 }
 0x250   :  { %v459_v61 = vpop.f32.mrf.mxu3 }
 0x252   :  { %v2266_v62 = vpop.eup %2265 }
 0x253   :  { %v483_v0 = vpop.f32.mrf.mxu0  ;;  %v536_v1 = vsel %vm297_vm1, %v2266_v62, 0.0 }
 0x254   :  { %537 = vadd.xlane.f32.xlu0 %v536_v1 }
 0x257   :  { %507 = vmax.xlane.f32.xlu2 %v506_v52 }
 0x26f   :  { %687 = vrot.lane.b32.xlu2 %v2809_v33, %s2628_s9 }
 0x2af   :  { %v493_v7 = vpop.xlane.xlu0 %492 }
 0x2b0   :  { %v511_v12 = vsub.f32 %v362_v17, %v493_v7 }
 0x2b2   :  { %v496_v4 = vpop.xlane.xlu2 %495  ;;  %v521_v33 = vmul.f32 1.442695, %v511_v12 }
 0x2b3   :  { %v512_v5 = vsub.f32 %v386_v34, %v496_v4 }
 0x2b5   :  { %v523_v6 = vmul.f32 1.442695, %v512_v5 }
 0x2b7   :  { %2267 = vpow2.f32 %v523_v6 }
 0x2ba   :  { %v535_v8 = vpop.xlane.xlu2 %534  ;;  %v499_v9 = vpop.xlane.xlu1 %498 }
 0x2bb   :  { %2269 = vrcp.f32 %v535_v8  ;;  %v513_v10 = vsub.f32 %v410_v43, %v499_v9 }
 0x2bd   :  { %v2268_v11 = vpop.eup %2267  ;;  %v525_v13 = vmul.f32 1.442695, %v513_v10 }
 0x2be   :  { %v542_v14 = vsel %vm297_vm1, %v2268_v11, 0.0 }
 0x2bf   :  { %2271 = vpow2.f32 %v525_v13  ;;  %543 = vadd.xlane.f32.xlu0 %v542_v14  ;;  %v505_v15 = vpop.xlane.xlu0 %504 }
 0x2c0   :  { %v515_v18 = vsub.f32 %v458_v54, %v505_v15 }
 0x2c1   :  { %v2270_v19 = vpop.eup %2269 }
 0x2c2   :  { %v565_v20 = vmul.f32 %v2270_v19, %v2264_v40  ;;  %v529_v21 = vmul.f32 1.442695, %v515_v18  ;;  %v502_v22 = vpop.xlane.xlu2 %501 }
 0x2c3   :  { %v514_v16 = vsub.f32 %v434_v55, %v502_v22 }
 0x2c4   :  { %v573_v24 = vpack.c.bf16 %v565_v20, %v565_v20  ;;  %2273 = vpow2.f32 %v529_v21 }
 0x2c5   :  { %v2881_v25 = vpop.eup %2271  ;;  %2275 = vpow2.f32 %v521_v33  ;;  %v527_v26 = vmul.f32 1.442695, %v514_v16 }
 0x2c6   :  { %2021 = vmatmul.msk.bf16.vlgmr.msra.gmra.mxu1 %vm297_vm1, %v573_v24  ;;  %v545_v27 = vsel %vm297_vm1, %v2881_v25, 0.0 }
 0x2c7   :  { %2277 = vpow2.f32 %v527_v26  ;;  %546 = vadd.xlane.f32.xlu1 %v545_v27  ;;  %v538_v28 = vpop.xlane.xlu0 %537 }
 0x2c8   :  { %2279 = vrcp.f32 %v538_v28 }
 0x2ca   :  { %v2274_v29 = vpop.eup %2273  ;;  %v508_v30 = vpop.xlane.xlu2 %507 }
 0x2cb   :  { %v2276_v17 = vpop.eup %2275  ;;  %v516_v31 = vsub.f32 %v482_v63, %v508_v30  ;;  %v551_v32 = vsel %vm297_vm1, %v2274_v29, 0.0 }
 0x2cc   :  { %552 = vadd.xlane.f32.xlu2 %v551_v32  ;;  %v539_v38 = vsel %vm297_vm1, %v2276_v17, 0.0  ;;  %v2169_v32 = vld [vmem:[%s3182_s4 + $0x8] sm:$0xff] }
 0x2cd   :  { %v2278_v34 = vpop.eup %2277  ;;  %v531_v35 = vmul.f32 1.442695, %v516_v31 }
 0x2ce   :  { %v2280_v36 = vpop.eup %2279  ;;  %v548_v37 = vsel %vm297_vm1, %v2278_v34, 0.0 }
 0x2cf   :  { %v566_v39 = vmul.f32 %v2280_v36, %v2266_v62  ;;  %2281 = vpow2.f32 %v531_v35  ;;  %549 = vadd.xlane.f32.xlu0 %v548_v37  ;;  %540 = vadd.xlane.f32.xlu1 %v539_v38 }
 0x2d1   :  { %v574_v40 = vpack.c.bf16 %v566_v39, %v566_v39 }
 0x2d2   :  { %v688_v41 = vpop.permute.xlu2 %687 }
 0x2d3   :  { %v693_v42 = vsel %vm586_vm2, %v688_v41, 0  ;;  %2022 = vmatmul.msk.bf16.vlgmr.msra.gmra.mxu2 %vm297_vm1, %v574_v40 }
 0x2d4   :  { %702 = vmatpush.bf16.msrb.mxu2 %v693_v42 }
 0x2d5   :  { %v2282_v43 = vpop.eup %2281 }
 0x2d6   :  { %v554_v47 = vsel %vm297_vm1, %v2282_v43, 0.0 }
 0x2d7   :  { %555 = vadd.xlane.f32.xlu0 %v554_v47 }
 0x2e4   :  { %729 = vrot.lane.b32.xlu2 %v2820_v44, %s2628_s9 }
 0x2e8   :  { %708 = vrot.lane.b32.xlu1 %v2822_v45, %s2628_s9 }
 0x2eb   :  { %666 = vrot.lane.b32.xlu0 %v2824_v46, %s2628_s9 }
 0x332   :  { %v544_v48 = vpop.xlane.xlu0 %543 }
 0x333   :  { %2283 = vrcp.f32 %v544_v48 }
 0x339   :  { %v2284_v49 = vpop.eup %2283 }
 0x33a   :  { %v568_v50 = vmul.f32 %v2284_v49, %v2268_v11  ;;  %v547_v51 = vpop.xlane.xlu1 %546 }
 0x33c   :  { %v576_v53 = vpack.c.bf16 %v568_v50, %v568_v50 }
 0x33e   :  { %2024 = vmatmul.msk.bf16.vlgmr.msrb.gmra.mxu0 %vm297_vm1, %v576_v53 }
 0x33f   :  { %v553_v54 = vpop.xlane.xlu2 %552 }
 0x342   :  { %v550_v55 = vpop.xlane.xlu0 %549  ;;  %v541_v56 = vpop.xlane.xlu1 %540 }
 0x343   :  { %2285 = vrcp.f32 %v550_v55  ;;  %v2899_v57 = vpop.f32.mrf.mxu1  ;;  %v2246_v55 = vld [vmem:[%s3183_s5] ss:$0 sm:$0xff] }
 0x344   :  { %2287 = vrcp.f32 %v541_v56 }
 0x347   :  { %v730_v44 = vpop.permute.xlu2 %729 }
 0x348   :  { %v735_v45 = vsel %vm586_vm2, %v730_v44, 0 }
 0x349   :  { %v2286_v58 = vpop.eup %2285  ;;  %744 = vmatpush.bf16.msra.mxu0 %v735_v45 }
 0x34a   :  { %v2288_v46 = vpop.eup %2287  ;;  %v570_v59 = vmul.f32 %v2286_v58, %v2278_v34  ;;  %v556_v60 = vpop.xlane.xlu0 %555  ;;  %v2168_v34 = vld [vmem:[%s3182_s4] sm:$0xff] }
 0x34b   :  { %v567_v61 = vmul.f32 %v2288_v46, %v2276_v17  ;;  %2289 = vrcp.f32 %v556_v60  ;;  %v601_v62 = vpop.f32.mrf.mxu1 }
 0x34c   :  { %v578_v63 = vpack.c.bf16 %v570_v59, %v570_v59  ;;  %2291 = vrcp.f32 %v553_v54 }
 0x34d   :  { %v575_v0 = vpack.c.bf16 %v567_v61, %v567_v61  ;;  %2293 = vrcp.f32 %v547_v51  ;;  %v2630_v61 = vmov 32.0  }
 0x34e   :  { %2026 = vmatmul.msk.bf16.vlgmr.msrb.gmra.mxu2 %vm297_vm1, %v578_v63  ;;  %2295 = vrcp.f32 %v2630_v61 }
 0x34f   :  { %2023 = vmatmul.msk.bf16.vlgmr.msra.gmra.mxu3 %vm297_vm1, %v575_v0 }
 0x351   :  { %v2290_v1 = vpop.eup %2289 }
 0x352   :  { %v572_v52 = vmul.f32 %v2290_v1, %v2282_v43  ;;  %v2292_v5 = vpop.eup %2291 }
 0x353   :  { %v2294_v7 = vpop.eup %2293  ;;  %v571_v8 = vmul.f32 %v2292_v5, %v2274_v29 }
 0x354   :  { %v580_v4 = vpack.c.bf16 %v572_v52, %v572_v52  ;;  %v569_v11 = vmul.f32 %v2294_v7, %v2881_v25  ;;  %v2296_v62 = vpop.eup %2295 }
 0x355   :  { %v579_v12 = vpack.c.bf16 %v571_v8, %v571_v8  ;;  %v831_v63 = vmul.f32 32.0, %v2296_v62  ;;  %vm835_vm5 = vweird.f32 %v2296_v62 }
 0x356   :  { %2028 = vmatmul.msk.bf16.vlgmr.msra.gmra.mxu0 %vm297_vm1, %v580_v4  ;;  %v620_v6 = vpop.f32.mrf.mxu2  ;;  %v577_v18 = vpack.c.bf16 %v569_v11, %v569_v11 }
 0x357   :  { %v832_v0 = vsub.f32 1.0, %v831_v63 }
 0x359   :  { %v833_v1 = vmul.f32 %v2296_v62, %v832_v0 }
 0x35a   :  { %v709_v9 = vpop.permute.xlu1 %708 }
 0x35b   :  { %v714_v10 = vsel %vm586_vm2, %v709_v9, 0  ;;  %v834_v52 = vadd.f32 %v2296_v62, %v833_v1 }
 0x35c   :  { %723 = vmatpush.bf16.msrb.mxu3 %v714_v10 }
 0x35d   :  { %v667_v13 = vpop.permute.xlu0 %666  ;;  %v2934_v4 = vsel %vm835_vm5, %v2296_v62, %v834_v52 }
 0x35e   :  { %v672_v14 = vsel %vm586_vm2, %v667_v13, 0  ;;  %v622_v15 = vpop.f32.mrf.mxu2  ;;  %v2171_v13 = vld [vmem:[%s3186_s8 + $0x8] sm:$0xff] }
 0x35f   :  { %681 = vmatpush.bf16.msrb.mxu1 %v672_v14  ;;  %2027 = vmatmul.msk.bf16.vlgmr.msrb.gmra.mxu3 %vm297_vm1, %v579_v12 }
 0x360   :  { %915 = vmatpush.bf16.msra.mxu2 %v2171_v13 }
 0x362   :  { %2025 = vmatmul.msk.bf16.vlgmr.msrb.gmra.mxu1 %vm297_vm1, %v577_v18 }
 0x363   :  { %812 = vmatpush.bf16.msra.mxu1 %v2169_v32 }
 0x367   :  { %813 = vmatpush.bf16.msra.mxu1 %v2168_v34  ;;  %v2247_v34 = vld [vmem:[%s3184_s6] ss:$0 sm:$0xff] }
 0x3bb   :  { %v662_v19 = vpop.f32.mrf.mxu0 }
 0x3c3   :  { %v664_v33 = vpop.f32.mrf.mxu0 }
 0x3d1   :  { %v704_v20 = vpop.f32.mrf.mxu2 }
 0x3d2   :  { %v641_v21 = vpop.f32.mrf.mxu3 }
 0x3d3   :  { %v2213_v22 = vpack.i.bf16 %v662_v19, %v641_v21  ;;  %v746_v16 = vpop.f32.mrf.mxu0  ;;  %v2170_v19 = vld [vmem:[%s3186_s8] sm:$0xff] }
 0x3d4   :  { %916 = vmatpush.bf16.msra.mxu2 %v2170_v19 }
 0x3d5   :  { %2214 = vrot.lane.b32.xlu0 %v2213_v22, %s2619_s0 }
 0x3d9   :  { %v706_v24 = vpop.f32.mrf.mxu2 }
 0x3da   :  { %v643_v25 = vpop.f32.mrf.mxu3 }
 0x3db   :  { %v748_v26 = vpop.f32.mrf.mxu0 }
 0x3df   :  { %v683_v27 = vpop.f32.mrf.mxu1 }
 0x3e0   :  { %v2218_v28 = vpack.i.bf16 %v704_v20, %v683_v27 }
 0x3e2   :  { %2219 = vrot.lane.b32.xlu1 %v2218_v28, %s3205_s30  ;;  %v725_v29 = vpop.f32.mrf.mxu3 }
 0x3e3   :  { %v2223_v30 = vpack.i.bf16 %v746_v16, %v725_v29 }
 0x3e5   :  { %2224 = vrot.lane.b32.xlu2 %v2223_v30, %s2629_s27 }
 0x3e7   :  { %v685_v17 = vpop.f32.mrf.mxu1 }
 0x3ea   :  { %v727_v31 = vpop.f32.mrf.mxu3 }
 0x43f   :  { %v2225_v38 = vpop.permute.xlu2 %2224 }
 0x440   :  { %v2227_v42 = vunpack.i.h.bf16 %v2225_v38  ;;  %v2226_v43 = vunpack.i.l.bf16 %v2225_v38  ;;  %v2248_v38 = vld [vmem:[#allocation7] ss:$0 sm:$0xff] }
 0x447   :  { %v2215_v35 = vpop.permute.xlu0 %2214 }
 0x448   :  { %v2217_v36 = vunpack.i.h.bf16 %v2215_v35  ;;  %v2216_v37 = vunpack.i.l.bf16 %v2215_v35 }
 0x44a   :  { %v775_v47 = vsel %vm297_vm1, %v620_v6, %v2217_v36  ;;  %v774_v48 = vsel %vm297_vm1, %v2899_v57, %v2216_v37 }
 0x454   :  { %v2220_v39 = vpop.permute.xlu1 %2219 }
 0x455   :  { %v2222_v40 = vunpack.i.h.bf16 %v2220_v39  ;;  %v2221_v41 = vunpack.i.l.bf16 %v2220_v39 }
 0x457   :  { %v778_v49 = vsel %vm776_vm3, %v775_v47, %v2222_v40  ;;  %v777_v50 = vsel %vm776_vm3, %v774_v48, %v2221_v41  ;;  %v2175_v48 = vld [vmem:[%s3188_s10 + $0x18] sm:$0xff] }
 0x458   :  { %v781_v51 = vsel %vm779_vm4, %v778_v49, %v2227_v42  ;;  %v780_v53 = vsel %vm779_vm4, %v777_v50, %v2226_v43  ;;  %986 = vmatpush.bf16.msra.mxu3 %v2175_v48  ;;  %v2174_v49 = vld [vmem:[%s3188_s10 + $0x10] sm:$0xff]  ;;  %v2173_v50 = vld [vmem:[%s3188_s10 + $0x8] sm:$0xff] }
 0x459   :  { %v782_v54 = vpack.c.bf16 %v781_v51, %v780_v53  ;;  %v2172_v51 = vld [vmem:[%s3188_s10] sm:$0xff]  ;;  %v2249_v53 = vld [vmem:[#allocation8] ss:$0 sm:$0xff] }
 0x45b   :  { %2037 = vmatmul.msk.bf16.vlgmr.msra.gmra.mxu1 %vm230_vm0, %v782_v54 }
 0x45c   :  { %987 = vmatpush.bf16.msra.mxu3 %v2174_v49 }
 0x460   :  { %988 = vmatpush.bf16.msra.mxu3 %v2173_v50 }
 0x464   :  { %989 = vmatpush.bf16.msra.mxu3 %v2172_v51 }
 0x4d8   :  { %v815_v56 = vpop.f32.mrf.mxu1 }
 0x4d9   :  { %v816_v44 = vadd.f32 %v2246_v55, %v815_v56 }
 0x4db   :  { %v820_v45 = vadd.f32 %v816_v44, %v2782_v2 }
 0x4dd   :  { %v824_v57 = vsel %vm230_vm0, %v820_v45, 0.0 }
 0x4de   :  { %825 = vadd.xlane.f32.xlu0 %v824_v57 }
 0x4e0   :  { %v817_v58 = vpop.f32.mrf.mxu1 }
 0x4e1   :  { %v818_v46 = vadd.f32 %v2246_v55, %v817_v58 }
 0x4e3   :  { %v821_v59 = vadd.f32 %v818_v46, %v2784_v3 }
 0x4e5   :  { %v827_v60 = vsel %vm230_vm0, %v821_v59, 0.0 }
 0x4e6   :  { %828 = vadd.xlane.f32.xlu1 %v827_v60 }
 0x551   :  { %v826_v2 = vpop.xlane.xlu0 %825 }
 0x552   :  { %v837_v5 = vmul.f32 %v2934_v4, %v826_v2 }
 0x554   :  { %v839_v6 = vsub.f32 %v820_v45, %v837_v5 }
 0x556   :  { %v841_v7 = vmul.f32 %v839_v6, %v839_v6 }
 0x558   :  { %v843_v3 = vsel %vm230_vm0, %v841_v7, 0.0 }
 0x559   :  { %v829_v8 = vpop.xlane.xlu1 %828  ;;  %844 = vadd.xlane.f32.xlu2 %v843_v3 }
 0x55a   :  { %v838_v9 = vmul.f32 %v2934_v4, %v829_v8 }
 0x55c   :  { %v840_v10 = vsub.f32 %v821_v59, %v838_v9 }
 0x55e   :  { %v842_v11 = vmul.f32 %v840_v10, %v840_v10 }
 0x560   :  { %v846_v12 = vsel %vm230_vm0, %v842_v11, 0.0 }
 0x561   :  { %847 = vadd.xlane.f32.xlu0 %v846_v12 }
 0x5cc   :  { %v845_v14 = vpop.xlane.xlu2 %844 }
 0x5cd   :  { %v849_v15 = vmul.f32 %v845_v14, %v2934_v4 }
 0x5cf   :  { %v851_v18 = vadd.f32 1e-12, %v849_v15 }
 0x5d1   :  { %2297 = vrsqrt.f32 %v851_v18  ;;  %vm859_vm7 = vweird.f32 %v851_v18 }
 0x5d4   :  { %v848_v33 = vpop.xlane.xlu0 %847 }
 0x5d5   :  { %v850_v20 = vmul.f32 %v848_v33, %v2934_v4 }
 0x5d7   :  { %v2298_v21 = vpop.eup %2297  ;;  %v852_v22 = vadd.f32 1e-12, %v850_v20 }
 0x5d8   :  { %v854_v16 = vmul.f32 %v2298_v21, %v851_v18  ;;  %vm860_vm6 = vweird.f32 %v2298_v21 }
 0x5d9   :  { %2299 = vrsqrt.f32 %v852_v22  ;;  %vm861_vm8 = vmor %vm859_vm7, %vm860_vm6  ;;  %vm869_vm10 = vweird.f32 %v852_v22 }
 0x5da   :  { %v855_v24 = vmul.f32 %v2298_v21, %v854_v16 }
 0x5dc   :  { %v856_v25 = vmul.f32 0.5, %v855_v24 }
 0x5de   :  { %v857_v26 = vsub.f32 1.5, %v856_v25 }
 0x5df   :  { %v2300_v27 = vpop.eup %2299 }
 0x5e0   :  { %v858_v28 = vmul.f32 %v2298_v21, %v857_v26  ;;  %v864_v29 = vmul.f32 %v2300_v27, %v852_v22  ;;  %vm870_vm9 = vweird.f32 %v2300_v27 }
 0x5e1   :  { %vm871_vm11 = vmor %vm869_vm10, %vm870_vm9 }
 0x5e2   :  { %v865_v30 = vmul.f32 %v2300_v27, %v864_v29  ;;  %v862_v17 = vsel %vm861_vm8, %v2298_v21, %v858_v28 }
 0x5e3   :  { %v873_v35 = vmul.f32 %v862_v17, %v839_v6 }
 0x5e4   :  { %v866_v31 = vmul.f32 0.5, %v865_v30  ;;  %v2177_v30 = vld [vmem:[%s3206_s2 + $0x18] sm:$0xff] }
 0x5e5   :  { %v878_v39 = vmul.f32 %v2247_v34, %v873_v35  ;;  %1086 = vmatpush.bf16.msrb.mxu0 %v2177_v30 }
 0x5e6   :  { %v867_v32 = vsub.f32 1.5, %v866_v31 }
 0x5e7   :  { %v883_v42 = vadd.f32 %v2248_v38, %v878_v39 }
 0x5e8   :  { %v868_v36 = vmul.f32 %v2300_v27, %v867_v32 }
 0x5ea   :  { %v872_v37 = vsel %vm871_vm11, %v2300_v27, %v868_v36 }
 0x5eb   :  { %v874_v40 = vmul.f32 %v872_v37, %v840_v10  ;;  %v2250_v10 = vld [vmem:[#allocation10] ss:$0 sm:$0xff] }
 0x5ed   :  { %v879_v41 = vmul.f32 %v2247_v34, %v874_v40  ;;  %v2176_v34 = vld [vmem:[%s3206_s2 + $0x10] sm:$0xff]  ;;  %s1988_s2 = sshll.u32 %s2631_s24, 4  ;;  %s1989_s2 = int_to_ptr.vmem [resolvable:$true] %s1988_s2 }
 0x5ee   :  { %1087 = vmatpush.bf16.msrb.mxu0 %v2176_v34 }
 0x5ef   :  { %v884_v43 = vadd.f32 %v2248_v38, %v879_v41 }
 0x5f1   :  { %v885_v47 = vpack.c.bf16 %v884_v43, %v883_v42 }
 0x5f3   :  { %2046 = vmatmul.msk.bf16.vlgmr.msra.gmra.mxu2 %vm230_vm0, %v885_v47 }
 0x676   :  { %v918_v54 = vpop.f32.mrf.mxu2 }
 0x677   :  { %v919_v55 = vadd.f32 %v2249_v53, %v918_v54  ;;  %v2251_v54 = vld [vmem:[%s3190_s12] ss:$0 sm:$0xff] }
 0x679   :  { %v925_v56 = vmul.f32 0.044715, %v919_v55  ;;  %v923_v5 = vmul.f32 0.5, %v919_v55 }
 0x67b   :  { %v927_v44 = vmul.f32 %v925_v56, %v919_v55 }
 0x67d   :  { %v929_v45 = vmul.f32 %v927_v44, %v919_v55 }
 0x67e   :  { %v920_v57 = vpop.f32.mrf.mxu2 }
 0x67f   :  { %v931_v58 = vadd.f32 %v929_v45, %v919_v55  ;;  %v921_v46 = vadd.f32 %v2249_v53, %v920_v57  ;;  %v2252_v45 = vld [vmem:[#allocation11] ss:$0 sm:$0xff] }
 0x681   :  { %v926_v59 = vmul.f32 0.044715, %v921_v46  ;;  %v933_v60 = vmul.f32 0.7978845, %v931_v58  ;;  %v924_v6 = vmul.f32 0.5, %v921_v46 }
 0x683   :  { %v928_v61 = vmul.f32 %v926_v59, %v921_v46  ;;  %2301 = vtanh.f32 %v933_v60 }
 0x685   :  { %v930_v62 = vmul.f32 %v928_v61, %v921_v46 }
 0x687   :  { %v932_v63 = vadd.f32 %v930_v62, %v921_v46  ;;  %v2253_v62 = vld [vmem:[%s3181_s3 + $0x1] ss:$0 sm:$0xff] }
 0x689   :  { %v934_v0 = vmul.f32 0.7978845, %v932_v63  ;;  %v2302_v1 = vpop.eup %2301 }
 0x68a   :  { %v937_v52 = vadd.f32 1.0, %v2302_v1 }
 0x68b   :  { %2303 = vtanh.f32 %v934_v0 }
 0x68c   :  { %v939_v3 = vmul.f32 %v937_v52, %v923_v5 }
 0x691   :  { %v2304_v2 = vpop.eup %2303 }
 0x692   :  { %v938_v7 = vadd.f32 1.0, %v2304_v2 }
 0x694   :  { %v940_v8 = vmul.f32 %v938_v7, %v924_v6 }
 0x696   :  { %v941_v9 = vpack.c.bf16 %v940_v8, %v939_v3 }
 0x698   :  { %2063 = vmatmul.msk.bf16.vlgmr.msra.gmra.mxu3 %vm978_vm12, %v941_v9 }
 0x71b   :  { %v991_v11 = vpop.f32.mrf.mxu3 }
 0x71c   :  { %v992_v12 = vadd.f32 %v2250_v10, %v991_v11 }
 0x71e   :  { %v996_v13 = vadd.f32 %v992_v12, %v883_v42 }
 0x720   :  { %v1000_v14 = vsel %vm230_vm0, %v996_v13, 0.0 }
 0x721   :  { %1001 = vadd.xlane.f32.xlu1 %v1000_v14 }
 0x723   :  { %v993_v15 = vpop.f32.mrf.mxu3 }
 0x724   :  { %v994_v18 = vadd.f32 %v2250_v10, %v993_v15 }
 0x726   :  { %v997_v19 = vadd.f32 %v994_v18, %v884_v43 }
 0x728   :  { %v1003_v33 = vsel %vm230_vm0, %v997_v19, 0.0 }
 0x729   :  { %1004 = vadd.xlane.f32.xlu2 %v1003_v33 }
 0x794   :  { %v1002_v20 = vpop.xlane.xlu1 %1001 }
 0x795   :  { %v1006_v21 = vmul.f32 %v1002_v20, %v2934_v4 }
 0x797   :  { %v1008_v22 = vsub.f32 %v996_v13, %v1006_v21 }
 0x799   :  { %v1010_v16 = vmul.f32 %v1008_v22, %v1008_v22 }
 0x79b   :  { %v1012_v24 = vsel %vm230_vm0, %v1010_v16, 0.0 }
 0x79c   :  { %v1005_v25 = vpop.xlane.xlu2 %1004  ;;  %1013 = vadd.xlane.f32.xlu0 %v1012_v24 }
 0x79d   :  { %v1007_v26 = vmul.f32 %v1005_v25, %v2934_v4 }
 0x79f   :  { %v1009_v27 = vsub.f32 %v997_v19, %v1007_v26 }
 0x7a1   :  { %v1011_v28 = vmul.f32 %v1009_v27, %v1009_v27 }
 0x7a3   :  { %v1015_v29 = vsel %vm230_vm0, %v1011_v28, 0.0 }
 0x7a4   :  { %1016 = vadd.xlane.f32.xlu1 %v1015_v29 }
 0x80f   :  { %v1014_v17 = vpop.xlane.xlu0 %1013 }
 0x810   :  { %v1018_v31 = vmul.f32 %v1014_v17, %v2934_v4 }
 0x812   :  { %v1020_v32 = vadd.f32 1e-12, %v1018_v31 }
 0x814   :  { %2305 = vrsqrt.f32 %v1020_v32  ;;  %vm1028_vm14 = vweird.f32 %v1020_v32 }
 0x817   :  { %v1017_v35 = vpop.xlane.xlu1 %1016 }
 0x818   :  { %v1019_v36 = vmul.f32 %v1017_v35, %v2934_v4 }
 0x81a   :  { %v2306_v37 = vpop.eup %2305  ;;  %v1021_v38 = vadd.f32 1e-12, %v1019_v36 }
 0x81b   :  { %v1023_v39 = vmul.f32 %v2306_v37, %v1020_v32  ;;  %vm1029_vm13 = vweird.f32 %v2306_v37 }
 0x81c   :  { %2307 = vrsqrt.f32 %v1021_v38  ;;  %vm1030_vm15 = vmor %vm1028_vm14, %vm1029_vm13  ;;  %vm1038_vm6 = vweird.f32 %v1021_v38 }
 0x81d   :  { %v1024_v40 = vmul.f32 %v2306_v37, %v1023_v39 }
 0x81f   :  { %v1025_v41 = vmul.f32 0.5, %v1024_v40 }
 0x821   :  { %v1026_v42 = vsub.f32 1.5, %v1025_v41 }
 0x822   :  { %v2308_v43 = vpop.eup %2307 }
 0x823   :  { %v1027_v47 = vmul.f32 %v2306_v37, %v1026_v42  ;;  %v1033_v48 = vmul.f32 %v2308_v43, %v1021_v38  ;;  %vm1039_vm5 = vweird.f32 %v2308_v43 }
 0x824   :  { %vm1040_vm7 = vmor %vm1038_vm6, %vm1039_vm5  ;;  %vm1913_vm5 = vcmask 1041409  }
 0x825   :  { %v1034_v49 = vmul.f32 %v2308_v43, %v1033_v48  ;;  %v1031_v50 = vsel %vm1030_vm15, %v2306_v37, %v1027_v47 }
 0x826   :  { %v1042_v55 = vmul.f32 %v1031_v50, %v1008_v22 }
 0x827   :  { %v1035_v51 = vmul.f32 0.5, %v1034_v49 }
 0x828   :  { %v1047_v57 = vmul.f32 %v2251_v54, %v1042_v55 }
 0x829   :  { %v1036_v53 = vsub.f32 1.5, %v1035_v51 }
 0x82a   :  { %v2982_v59 = vadd.f32 %v2252_v45, %v1047_v57 }
 0x82b   :  { %v1037_v56 = vmul.f32 %v2308_v43, %v1036_v53 }
 0x82d   :  { %v1041_v44 = vsel %vm1040_vm7, %v2308_v43, %v1037_v56 }
 0x82e   :  { %v1043_v58 = vmul.f32 %v1041_v44, %v1009_v27 }
 0x830   :  { %v1048_v46 = vmul.f32 %v2251_v54, %v1043_v58 }
 0x832   :  { %v2984_v60 = vadd.f32 %v2252_v45, %v1048_v46 }
 0x834   :  { %v1054_v61 = vpack.c.bf16 %v2984_v60, %v2982_v59 }
 0x836   :  { %2077 = vmatmul.msk.bf16.vlgmr.msrb.gmra.mxu0 %vm230_vm0, %v1054_v61 }
 0x8b3   :  { %v1089_v63 = vpop.f32.mrf.mxu0 }
 0x8b4   :  { %v1090_v0 = vadd.f32 %v2253_v62, %v1089_v63 }
 0x8b6   :  { %1096 = vrot.lane.b32.xlu2 %v1090_v0, %s2625_s13  ;;  %v1130_v5 = vpack.c.bf16 %v1090_v0, %v1090_v0  ;;  %v1114_v38 = vmul.f32 0.35355338, %v1090_v0 }
 0x8b8   :  { %v1139_v7 = vunpack.c.l.b16 %v1130_v5  ;;  %v1122_v40 = vpack.c.bf16 %v1114_v38, %v1114_v38 }
 0x8ba   :  { %v3000_v8 = vpack.c.b16 %v1139_v7, %v1139_v7  ;;  %v2355_v7 = vld [vmem:[#allocation5] ss:$0 sm:$0xff] }
 0x8bb   :  { %v1091_v1 = vpop.f32.mrf.mxu0 }
 0x8bc   :  { %v1092_v52 = vadd.f32 %v2253_v62, %v1091_v1 }
 0x8be   :  { %1104 = vrot.lane.b32.xlu1 %v1092_v52, %s2624_s23  ;;  %1098 = vrot.lane.b32.xlu0 %v1092_v52, %s2625_s13  ;;  %v1131_v2 = vpack.c.bf16 %v1092_v52, %v1092_v52  ;;  %v1115_v39 = vmul.f32 0.35355338, %v1092_v52 }
 0x8bf   :  { %1102 = vrot.lane.b32.xlu2 %v1090_v0, %s2624_s23 }
 0x8c0   :  { %v1163_v6 = vunpack.c.l.b16 %v1131_v2  ;;  %v1123_v41 = vpack.c.bf16 %v1115_v39, %v1115_v39 }
 0x8c2   :  { %v2998_v3 = vpack.c.b16 %v1163_v6, %v1163_v6 }
 0x8c6   :  { %1110 = vrot.lane.b32.xlu1 %v1092_v52, %s2626_s16  ;;  %1108 = vrot.lane.b32.xlu0 %v1090_v0, %s2626_s16 }
 0x8ce   :  { %1165 = vrot.lane.b32.xlu0 %v2998_v3, %s2627_s7  ;;  %1141 = vrot.lane.b32.xlu1 %v3000_v8, %s2627_s7 }
 0x910   :  { %v1097_v9 = vpop.permute.xlu2 %1096 }
 0x911   :  { %v1132_v10 = vpack.c.bf16 %v1097_v9, %v1097_v9  ;;  %v1116_v47 = vmul.f32 0.35355338, %v1097_v9 }
 0x913   :  { %v1187_v11 = vunpack.c.l.b16 %v1132_v10  ;;  %v1124_v48 = vpack.c.bf16 %v1116_v47, %v1116_v47 }
 0x915   :  { %v3006_v12 = vpack.c.b16 %v1187_v11, %v1187_v11 }
 0x917   :  { %1189 = vrot.lane.b32.xlu2 %v3006_v12, %s2627_s7 }
 0x919   :  { %v1103_v19 = vpop.permute.xlu2 %1102 }
 0x91a   :  { %v1134_v21 = vpack.c.bf16 %v1103_v19, %v1103_v19  ;;  %v1118_v63 = vmul.f32 0.35355338, %v1103_v19 }
 0x91c   :  { %v1235_v26 = vunpack.c.l.b16 %v1134_v21  ;;  %v1126_v1 = vpack.c.bf16 %v1118_v63, %v1118_v63 }
 0x91e   :  { %v3018_v17 = vpack.c.b16 %v1235_v26, %v1235_v26 }
 0x930   :  { %v1105_v13 = vpop.permute.xlu1 %1104  ;;  %v1099_v14 = vpop.permute.xlu0 %1098 }
 0x931   :  { %v1135_v15 = vpack.c.bf16 %v1105_v13, %v1105_v13  ;;  %v1133_v18 = vpack.c.bf16 %v1099_v14, %v1099_v14  ;;  %v1119_v51 = vmul.f32 0.35355338, %v1105_v13  ;;  %v1117_v45 = vmul.f32 0.35355338, %v1099_v14 }
 0x933   :  { %v1259_v33 = vunpack.c.l.b16 %v1135_v15  ;;  %v1211_v20 = vunpack.c.l.b16 %v1133_v18  ;;  %v1127_v53 = vpack.c.bf16 %v1119_v51, %v1119_v51  ;;  %v1125_v57 = vpack.c.bf16 %v1117_v45, %v1117_v45 }
 0x935   :  { %v3010_v22 = vpack.c.b16 %v1259_v33, %v1259_v33  ;;  %v3012_v16 = vpack.c.b16 %v1211_v20, %v1211_v20 }
 0x937   :  { %1213 = vrot.lane.b32.xlu0 %v3012_v16, %s2627_s7  ;;  %1261 = vrot.lane.b32.xlu2 %v3010_v22, %s2627_s7 }
 0x938   :  { %v1111_v24 = vpop.permute.xlu1 %1110  ;;  %v1109_v25 = vpop.permute.xlu0 %1108 }
 0x939   :  { %v1137_v27 = vpack.c.bf16 %v1111_v24, %v1111_v24  ;;  %v1136_v28 = vpack.c.bf16 %v1109_v25, %v1109_v25  ;;  %v1120_v0 = vmul.f32 0.35355338, %v1109_v25  ;;  %v1121_v2 = vmul.f32 0.35355338, %v1111_v24 }
 0x93b   :  { %v1307_v29 = vunpack.c.l.b16 %v1137_v27  ;;  %v1283_v30 = vunpack.c.l.b16 %v1136_v28  ;;  %v1128_v52 = vpack.c.bf16 %v1120_v0, %v1120_v0  ;;  %v1129_v5 = vpack.c.bf16 %v1121_v2, %v1121_v2 }
 0x93d   :  { %v3020_v31 = vpack.c.b16 %v1307_v29, %v1307_v29  ;;  %v3022_v32 = vpack.c.b16 %v1283_v30, %v1283_v30 }
 0x93f   :  { %1309 = vrot.lane.b32.xlu2 %v3020_v31, %s2627_s7  ;;  %1237 = vrot.lane.b32.xlu0 %v3018_v17, %s2627_s7 }
 0x940   :  { %1285 = vrot.lane.b32.xlu1 %v3022_v32, %s2627_s7  ;;  %v1166_v34 = vpop.permute.xlu0 %1165  ;;  %v1142_v35 = vpop.permute.xlu1 %1141 }
 0x941   :  { %v1171_v36 = vsel %vm297_vm1, %v1166_v34, 0  ;;  %v1147_v37 = vsel %vm297_vm1, %v1142_v35, 0 }
 0x942   :  { %1156 = vmatpush.bf16.xpose.msrb.mxu1 %v1147_v37  ;;  %1180 = vmatpush.bf16.xpose.msrb.mxu2 %v1171_v36 }
 0x949   :  { %2078 = vmatmul.msk.bf16.vlgmr.msrb.gmra.mxu1 %vm297_vm1, %v1122_v40  ;;  %2079 = vmatmul.msk.bf16.vlgmr.msrb.gmra.mxu2 %vm297_vm1, %v1123_v41 }
 0x971   :  { %v1190_v42 = vpop.permute.xlu2 %1189 }
 0x972   :  { %v1195_v43 = vsel %vm297_vm1, %v1190_v42, 0 }
 0x973   :  { %1204 = vmatpush.bf16.xpose.msrb.mxu3 %v1195_v43 }
 0x97a   :  { %2080 = vmatmul.msk.bf16.vlgmr.msrb.gmra.mxu3 %vm297_vm1, %v1124_v48 }
 0x991   :  { %v1262_v49 = vpop.permute.xlu2 %1261 }
 0x992   :  { %v1267_v50 = vsel %vm297_vm1, %v1262_v49, 0 }
 0x993   :  { %1276 = vmatpush.bf16.xpose.msra.mxu2 %v1267_v50 }
 0x999   :  { %v1310_v54 = vpop.permute.xlu2 %1309 }
 0x99a   :  { %2083 = vmatmul.msk.bf16.vlgmr.msra.gmra.mxu2 %vm297_vm1, %v1127_v53  ;;  %v1315_v44 = vsel %vm297_vm1, %v1310_v54, 0  ;;  %v2356_v54 = vld [vmem:[#allocation5 + $0x1] ss:$0 sm:$0xff] }
 0x9a9   :  { %v1214_v55 = vpop.permute.xlu0 %1213 }
 0x9aa   :  { %v1219_v56 = vsel %vm297_vm1, %v1214_v55, 0 }
 0x9ab   :  { %1228 = vmatpush.bf16.xpose.msra.mxu0 %v1219_v56 }
 0x9b1   :  { %v1238_v58 = vpop.permute.xlu0 %1237 }
 0x9b2   :  { %v1243_v46 = vsel %vm297_vm1, %v1238_v58, 0  ;;  %v1286_v61 = vpop.permute.xlu1 %1285  ;;  %2081 = vmatmul.msk.bf16.vlgmr.msra.gmra.mxu0 %vm297_vm1, %v1125_v57 }
 0x9b3   :  { %1324 = vmatpush.bf16.xpose.msrb.mxu0 %v1315_v44  ;;  %v1291_v62 = vsel %vm297_vm1, %v1286_v61, 0  ;;  %1252 = vmatpush.bf16.xpose.msra.mxu1 %v1243_v46 }
 0x9b4   :  { %1300 = vmatpush.bf16.xpose.msra.mxu3 %v1291_v62 }
 0x9ba   :  { %2082 = vmatmul.msk.bf16.vlgmr.msra.gmra.mxu1 %vm297_vm1, %v1126_v1 }
 0x9bb   :  { %2084 = vmatmul.msk.bf16.vlgmr.msra.gmra.mxu3 %vm297_vm1, %v1128_v52 }
 0x9c2   :  { %2085 = vmatmul.msk.bf16.vlgmr.msrb.gmra.mxu0 %vm297_vm1, %v1129_v5 }
 0x9c6   :  { %v1158_v6 = vpop.f32.mrf.mxu1 }
 0x9c7   :  { %v1159_v9 = vadd.f32 %v2355_v7, %v1158_v6 }
 0x9c9   :  { %v1330_v10 = vsel %vm297_vm1, %v1159_v9, -inf }
 0x9ca   :  { %1331 = vmax.xlane.f32.xlu2 %v1330_v10 }
 0x9cc   :  { %v1182_v11 = vpop.f32.mrf.mxu2 }
 0x9cd   :  { %v1183_v13 = vadd.f32 %v2856_v23, %v1182_v11 }
 0x9ce   :  { %v1160_v14 = vpop.f32.mrf.mxu1 }
 0x9cf   :  { %v1333_v15 = vsel %vm297_vm1, %v1183_v13, -inf }
 0x9d0   :  { %1334 = vmax.xlane.f32.xlu1 %v1333_v15 }
 0x9d4   :  { %v1184_v18 = vpop.f32.mrf.mxu2 }
 0x9e2   :  { %1426 = vrot.lane.b32.xlu2 %v3000_v8, %s2628_s9 }
 0x9fd   :  { %v1206_v19 = vpop.f32.mrf.mxu3 }
 0x9fe   :  { %v1207_v33 = vadd.f32 %v2355_v7, %v1206_v19 }
 0xa00   :  { %v1336_v20 = vsel %vm297_vm1, %v1207_v33, -inf }
 0xa01   :  { %1337 = vmax.xlane.f32.xlu0 %v1336_v20 }
 0xa05   :  { %v1208_v21 = vpop.f32.mrf.mxu3 }
 0xa15   :  { %1468 = vrot.lane.b32.xlu0 %v3006_v12, %s2628_s9 }
 0xa1d   :  { %v1278_v24 = vpop.f32.mrf.mxu2 }
 0xa1e   :  { %v1279_v55 = vadd.f32 %v2356_v54, %v1278_v24 }
 0xa20   :  { %v1345_v45 = vsel %vm297_vm1, %v1279_v55, -inf }
 0xa25   :  { %v1280_v25 = vpop.f32.mrf.mxu2 }
 0xa2f   :  { %v1230_v26 = vpop.f32.mrf.mxu0 }
 0xa30   :  { %v1231_v8 = vadd.f32 %v2856_v23, %v1230_v26 }
 0xa32   :  { %v1339_v41 = vsel %vm297_vm1, %v1231_v8, -inf }
 0xa37   :  { %v1232_v27 = vpop.f32.mrf.mxu0  ;;  %v1254_v28 = vpop.f32.mrf.mxu1 }
 0xa38   :  { %v1255_v29 = vadd.f32 %v2355_v7, %v1254_v28 }
 0xa3a   :  { %v1342_v30 = vsel %vm297_vm1, %v1255_v29, -inf }
 0xa3b   :  { %1343 = vmax.xlane.f32.xlu1 %v1342_v30 }
 0xa3d   :  { %v1332_v34 = vpop.xlane.xlu2 %1331 }
 0xa3e   :  { %v1302_v35 = vpop.f32.mrf.mxu3  ;;  %v1354_v36 = vsub.f32 %v1159_v9, %v1332_v34 }
 0xa3f   :  { %v1303_v37 = vadd.f32 %v2355_v7, %v1302_v35  ;;  %v1256_v38 = vpop.f32.mrf.mxu1  ;;  %v1326_v39 = vpop.f32.mrf.mxu0 }
 0xa40   :  { %v1362_v40 = vmul.f32 1.442695, %v1354_v36  ;;  %v1327_v57 = vadd.f32 %v2356_v54, %v1326_v39 }
 0xa41   :  { %v1348_v12 = vsel %vm297_vm1, %v1303_v37, -inf }
 0xa42   :  { %2309 = vpow2.f32 %v1362_v40  ;;  %1349 = vmax.xlane.f32.xlu2 %v1348_v12  ;;  %v1351_v58 = vsel %vm297_vm1, %v1327_v57, -inf }
 0xa43   :  { %v1335_v42 = vpop.xlane.xlu1 %1334  ;;  %1340 = vmax.xlane.f32.xlu1 %v1339_v41 }
 0xa44   :  { %v1355_v43 = vsub.f32 %v1183_v13, %v1335_v42 }
 0xa45   :  { %v1427_v47 = vpop.permute.xlu2 %1426 }
 0xa46   :  { %v1364_v48 = vmul.f32 1.442695, %v1355_v43  ;;  %v1304_v49 = vpop.f32.mrf.mxu3  ;;  %v1432_v23 = vsel %vm586_vm2, %v1427_v47, 0 }
 0xa47   :  { %v1328_v50 = vpop.f32.mrf.mxu0  ;;  %1441 = vmatpush.bf16.msrb.mxu1 %v1432_v23 }
 0xa48   :  { %v2310_v51 = vpop.eup %2309  ;;  %2311 = vpow2.f32 %v1364_v48 }
 0xa49   :  { %v1378_v53 = vsel %vm297_vm1, %v2310_v51, 0.0 }
 0xa4a   :  { %1379 = vadd.xlane.f32.xlu0 %v1378_v53 }
 0xa4e   :  { %v2312_v56 = vpop.eup %2311 }
 0xa4f   :  { %v1381_v44 = vsel %vm297_vm1, %v2312_v56, 0.0 }
 0xa50   :  { %1382 = vadd.xlane.f32.xlu2 %v1381_v44 }
 0xa52   :  { %1346 = vmax.xlane.f32.xlu0 %v1345_v45 }
 0xa5a   :  { %1352 = vmax.xlane.f32.xlu0 %v1351_v58 }
 0xa5c   :  { %1447 = vrot.lane.b32.xlu1 %v2998_v3, %s2628_s9 }
 0xa6e   :  { %1489 = vrot.lane.b32.xlu0 %v3012_v16, %s2628_s9 }
 0xa74   :  { %v1338_v46 = vpop.xlane.xlu0 %1337 }
 0xa75   :  { %v1356_v61 = vsub.f32 %v1207_v33, %v1338_v46 }
 0xa77   :  { %v1366_v62 = vmul.f32 1.442695, %v1356_v61 }
 0xa79   :  { %2313 = vpow2.f32 %v1366_v62 }
 0xa7f   :  { %v3067_v63 = vpop.eup %2313 }
 0xa80   :  { %v1384_v0 = vsel %vm297_vm1, %v3067_v63, 0.0 }
 0xa86   :  { %1385 = vadd.xlane.f32.xlu1 %v1384_v0 }
 0xa87   :  { %v1469_v1 = vpop.permute.xlu0 %1468 }
 0xa88   :  { %v1474_v52 = vsel %vm586_vm2, %v1469_v1, 0 }
 0xa89   :  { %1483 = vmatpush.bf16.msrb.mxu3 %v1474_v52 }
 0xaae   :  { %v1344_v2 = vpop.xlane.xlu1 %1343 }
 0xaaf   :  { %v1358_v5 = vsub.f32 %v1255_v29, %v1344_v2 }
 0xab1   :  { %v1370_v3 = vmul.f32 1.442695, %v1358_v5 }
 0xab3   :  { %2315 = vpow2.f32 %v1370_v3 }
 0xab5   :  { %v1350_v6 = vpop.xlane.xlu2 %1349 }
 0xab6   :  { %v1341_v16 = vpop.xlane.xlu1 %1340  ;;  %v1360_v10 = vsub.f32 %v1303_v37, %v1350_v6 }
 0xab7   :  { %v1357_v7 = vsub.f32 %v1231_v8, %v1341_v16 }
 0xab8   :  { %v1374_v14 = vmul.f32 1.442695, %v1360_v10 }
 0xab9   :  { %v3072_v9 = vpop.eup %2315  ;;  %v1368_v11 = vmul.f32 1.442695, %v1357_v7 }
 0xaba   :  { %v1390_v13 = vsel %vm297_vm1, %v3072_v9, 0.0 }
 0xabb   :  { %2317 = vpow2.f32 %v1368_v11  ;;  %1391 = vadd.xlane.f32.xlu0 %v1390_v13 }
 0xabd   :  { %v1380_v15 = vpop.xlane.xlu0 %1379 }
 0xabe   :  { %2319 = vrcp.f32 %v1380_v15 }
 0xabf   :  { %2321 = vpow2.f32 %v1374_v14 }
 0xac1   :  { %v2318_v18 = vpop.eup %2317 }
 0xac2   :  { %v1387_v19 = vsel %vm297_vm1, %v2318_v18, 0.0 }
 0xac3   :  { %1388 = vadd.xlane.f32.xlu2 %v1387_v19  ;;  %v1383_v33 = vpop.xlane.xlu2 %1382 }
 0xac4   :  { %v2320_v20 = vpop.eup %2319  ;;  %2323 = vrcp.f32 %v1383_v33 }
 0xac5   :  { %v1410_v21 = vmul.f32 %v2320_v20, %v2310_v51  ;;  %v1347_v24 = vpop.xlane.xlu0 %1346  ;;  %v2322_v26 = vpop.eup %2321 }
 0xac6   :  { %v1359_v25 = vsub.f32 %v1279_v55, %v1347_v24  ;;  %v1396_v30 = vsel %vm297_vm1, %v2322_v26, 0.0 }
 0xac7   :  { %v1418_v27 = vpack.c.bf16 %v1410_v21, %v1410_v21 }
 0xac8   :  { %v1372_v28 = vmul.f32 1.442695, %v1359_v25 }
 0xac9   :  { %2086 = vmatmul.msk.bf16.vlgmr.msrb.gmra.mxu1 %vm297_vm1, %v1418_v27 }
 0xaca   :  { %v2324_v29 = vpop.eup %2323  ;;  %2325 = vpow2.f32 %v1372_v28 }
 0xacb   :  { %1397 = vadd.xlane.f32.xlu2 %v1396_v30  ;;  %v1411_v34 = vmul.f32 %v2324_v29, %v2312_v56 }
 0xacd   :  { %v1353_v8 = vpop.xlane.xlu0 %1352  ;;  %v1419_v40 = vpack.c.bf16 %v1411_v34, %v1411_v34 }
 0xace   :  { %v1361_v35 = vsub.f32 %v1327_v57, %v1353_v8  ;;  %v1448_v36 = vpop.permute.xlu1 %1447 }
 0xacf   :  { %v1453_v37 = vsel %vm586_vm2, %v1448_v36, 0  ;;  %1552 = vrot.lane.b32.xlu0 %v3022_v32, %s2628_s9  ;;  %v2179_v36 = vld [vmem:[%s3182_s4 + $0x18] sm:$0xff] }
 0xad0   :  { %v2326_v38 = vpop.eup %2325  ;;  %v1376_v39 = vmul.f32 1.442695, %v1361_v35  ;;  %1462 = vmatpush.bf16.msrb.mxu2 %v1453_v37  ;;  %v2178_v37 = vld [vmem:[%s3182_s4 + $0x10] sm:$0xff] }
 0xad1   :  { %v1393_v12 = vsel %vm297_vm1, %v2326_v38, 0.0 }
 0xad2   :  { %2327 = vpow2.f32 %v1376_v39  ;;  %1394 = vadd.xlane.f32.xlu1 %v1393_v12 }
 0xad3   :  { %2087 = vmatmul.msk.bf16.vlgmr.msrb.gmra.mxu2 %vm297_vm1, %v1419_v40 }
 0xad7   :  { %1573 = vrot.lane.b32.xlu0 %v3020_v31, %s2628_s9 }
 0xad8   :  { %v2328_v41 = vpop.eup %2327 }
 0xad9   :  { %v1399_v42 = vsel %vm297_vm1, %v2328_v41, 0.0 }
 0xada   :  { %1400 = vadd.xlane.f32.xlu2 %v1399_v42 }
 0xae0   :  { %v1490_v43 = vpop.permute.xlu0 %1489 }
 0xae1   :  { %v1495_v32 = vsel %vm586_vm2, %v1490_v43, 0 }
 0xae2   :  { %1504 = vmatpush.bf16.msra.mxu0 %v1495_v32 }
 0xaeb   :  { %1531 = vrot.lane.b32.xlu1 %v3010_v22, %s2628_s9 }
 0xaf2   :  { %1510 = vrot.lane.b32.xlu2 %v3018_v17, %s2628_s9 }
 0xaf9   :  { %v1386_v47 = vpop.xlane.xlu1 %1385 }
 0xafa   :  { %2329 = vrcp.f32 %v1386_v47 }
 0xb00   :  { %v2330_v48 = vpop.eup %2329 }
 0xb01   :  { %v1412_v49 = vmul.f32 %v2330_v48, %v3067_v63 }
 0xb03   :  { %v1420_v31 = vpack.c.bf16 %v1412_v49, %v1412_v49 }
 0xb05   :  { %2088 = vmatmul.msk.bf16.vlgmr.msrb.gmra.mxu3 %vm297_vm1, %v1420_v31 }
 0xb2e   :  { %v1392_v50 = vpop.xlane.xlu0 %1391 }
 0xb36   :  { %v1389_v23 = vpop.xlane.xlu2 %1388 }
 0xb37   :  { %2331 = vrcp.f32 %v1389_v23 }
 0xb3d   :  { %v2332_v51 = vpop.eup %2331 }
 0xb3e   :  { %v1413_v53 = vmul.f32 %v2332_v51, %v2318_v18  ;;  %v1398_v54 = vpop.xlane.xlu2 %1397 }
 0xb3f   :  { %2333 = vrcp.f32 %v1398_v54  ;;  %v2254_v54 = vld [vmem:[%s3183_s5 + $0x1] ss:$0 sm:$0xff] }
 0xb40   :  { %v1421_v55 = vpack.c.bf16 %v1413_v53, %v1413_v53  ;;  %2335 = vrcp.f32 %v1392_v50 }
 0xb41   :  { %v1553_v22 = vpop.permute.xlu0 %1552 }
 0xb42   :  { %v1558_v56 = vsel %vm586_vm2, %v1553_v22, 0  ;;  %2089 = vmatmul.msk.bf16.vlgmr.msra.gmra.mxu0 %vm297_vm1, %v1421_v55 }
 0xb43   :  { %1567 = vmatpush.bf16.msra.mxu3 %v1558_v56 }
 0xb45   :  { %v2334_v17 = vpop.eup %2333  ;;  %v1395_v63 = vpop.xlane.xlu1 %1394 }
 0xb46   :  { %v1416_v44 = vmul.f32 %v2334_v17, %v2322_v26  ;;  %v3096_v45 = vpop.f32.mrf.mxu1  ;;  %v2336_v0 = vpop.eup %2335 }
 0xb47   :  { %v1414_v52 = vmul.f32 %v2336_v0, %v3072_v9 }
 0xb48   :  { %v1424_v57 = vpack.c.bf16 %v1416_v44, %v1416_v44 }
 0xb49   :  { %v1574_v58 = vpop.permute.xlu0 %1573  ;;  %v1422_v7 = vpack.c.bf16 %v1414_v52, %v1414_v52 }
 0xb4a   :  { %v1579_v46 = vsel %vm586_vm2, %v1574_v58, 0  ;;  %2092 = vmatmul.msk.bf16.vlgmr.msra.gmra.mxu3 %vm297_vm1, %v1424_v57 }
 0xb4b   :  { %1588 = vmatpush.bf16.msrb.mxu0 %v1579_v46 }
 0xb4d   :  { %v1401_v61 = vpop.xlane.xlu2 %1400 }
 0xb4e   :  { %2337 = vrcp.f32 %v1401_v61  ;;  %v1445_v62 = vpop.f32.mrf.mxu1 }
 0xb4f   :  { %2339 = vrcp.f32 %v1395_v63 }
 0xb54   :  { %v2338_v1 = vpop.eup %2337 }
 0xb55   :  { %v1417_v2 = vmul.f32 %v2338_v1, %v2328_v41  ;;  %v1511_v5 = vpop.permute.xlu2 %1510  ;;  %v2340_v10 = vpop.eup %2339 }
 0xb56   :  { %v1516_v3 = vsel %vm586_vm2, %v1511_v5, 0  ;;  %v1464_v6 = vpop.f32.mrf.mxu2  ;;  %v1415_v11 = vmul.f32 %v2340_v10, %v2326_v38 }
 0xb57   :  { %v1425_v16 = vpack.c.bf16 %v1417_v2, %v1417_v2  ;;  %1525 = vmatpush.bf16.msra.mxu1 %v1516_v3 }
 0xb58   :  { %v1423_v9 = vpack.c.bf16 %v1415_v11, %v1415_v11 }
 0xb59   :  { %2093 = vmatmul.msk.bf16.vlgmr.msrb.gmra.mxu0 %vm297_vm1, %v1425_v16 }
 0xb5a   :  { %2090 = vmatmul.msk.bf16.vlgmr.msra.gmra.mxu1 %vm297_vm1, %v1422_v7  ;;  %v2180_v7 = vld [vmem:[%s3186_s8 + $0x10] sm:$0xff] }
 0xb5b   :  { %1656 = vmatpush.bf16.msrb.mxu1 %v2179_v36 }
 0xb5d   :  { %v1532_v13 = vpop.permute.xlu1 %1531 }
 0xb5e   :  { %v1537_v14 = vsel %vm586_vm2, %v1532_v13, 0  ;;  %v1466_v15 = vpop.f32.mrf.mxu2 }
 0xb5f   :  { %1546 = vmatpush.bf16.msra.mxu2 %v1537_v14  ;;  %1657 = vmatpush.bf16.msrb.mxu1 %v2178_v37 }
 0xb62   :  { %2091 = vmatmul.msk.bf16.vlgmr.msra.gmra.mxu2 %vm297_vm1, %v1423_v9 }
 0xb88   :  { %v1485_v18 = vpop.f32.mrf.mxu3 }
 0xb90   :  { %v1487_v19 = vpop.f32.mrf.mxu3 }
 0xbbf   :  { %v1506_v33 = vpop.f32.mrf.mxu0 }
 0xbc0   :  { %v2228_v20 = vpack.i.bf16 %v1506_v33, %v1485_v18 }
 0xbc2   :  { %2229 = vrot.lane.b32.xlu1 %v2228_v20, %s2619_s0 }
 0xbc7   :  { %v1508_v21 = vpop.f32.mrf.mxu0 }
 0xbcd   :  { %v1569_v24 = vpop.f32.mrf.mxu3 }
 0xbd5   :  { %v1571_v25 = vpop.f32.mrf.mxu3 }
 0xbd6   :  { %v1590_v26 = vpop.f32.mrf.mxu0 }
 0xbd7   :  { %v2238_v27 = vpack.i.bf16 %v1590_v26, %v1569_v24  ;;  %v1527_v28 = vpop.f32.mrf.mxu1 }
 0xbd9   :  { %2239 = vrot.lane.b32.xlu0 %v2238_v27, %s2629_s27 }
 0xbde   :  { %v1592_v29 = vpop.f32.mrf.mxu0 }
 0xbdf   :  { %v1529_v30 = vpop.f32.mrf.mxu1 }
 0xbe5   :  { %v1548_v34 = vpop.f32.mrf.mxu2 }
 0xbe6   :  { %v2233_v8 = vpack.i.bf16 %v1548_v34, %v1527_v28  ;;  %v2255_v28 = vld [vmem:[%s3184_s6 + $0x1] ss:$0 sm:$0xff] }
 0xbe8   :  { %2234 = vrot.lane.b32.xlu2 %v2233_v8, %s3205_s30  ;;  %v2256_v8 = vld [vmem:[#allocation7 + $0x1] ss:$0 sm:$0xff] }
 0xbed   :  { %v1550_v35 = vpop.f32.mrf.mxu2 }
 0xc34   :  { %v2230_v38 = vpop.permute.xlu1 %2229 }
 0xc35   :  { %v2232_v40 = vunpack.i.h.bf16 %v2230_v38  ;;  %v2231_v12 = vunpack.i.l.bf16 %v2230_v38 }
 0xc37   :  { %v1619_v32 = vsel %vm297_vm1, %v1464_v6, %v2232_v40  ;;  %v1618_v47 = vsel %vm297_vm1, %v3096_v45, %v2231_v12  ;;  %v2185_v12 = vld [vmem:[%s3188_s10 + $0x38] sm:$0xff] }
 0xc38   :  { %1828 = vmatpush.bf16.msrb.mxu3 %v2185_v12 }
 0xc42   :  { %v2235_v39 = vpop.permute.xlu2 %2234 }
 0xc43   :  { %v2237_v41 = vunpack.i.h.bf16 %v2235_v39  ;;  %v2236_v42 = vunpack.i.l.bf16 %v2235_v39 }
 0xc45   :  { %v1621_v31 = vsel %vm776_vm3, %v1619_v32, %v2237_v41  ;;  %v1620_v23 = vsel %vm776_vm3, %v1618_v47, %v2236_v42  ;;  %v2184_v41 = vld [vmem:[%s3188_s10 + $0x30] sm:$0xff]  ;;  %v2183_v42 = vld [vmem:[%s3188_s10 + $0x28] sm:$0xff] }
 0xc46   :  { %1829 = vmatpush.bf16.msrb.mxu3 %v2184_v41  ;;  %v2257_v32 = vld [vmem:[#allocation8 + $0x1] ss:$0 sm:$0xff] }
 0xc4a   :  { %1830 = vmatpush.bf16.msrb.mxu3 %v2183_v42 }
 0xc4b   :  { %v2240_v43 = vpop.permute.xlu0 %2239 }
 0xc4c   :  { %v2242_v48 = vunpack.i.h.bf16 %v2240_v43  ;;  %v2241_v49 = vunpack.i.l.bf16 %v2240_v43  ;;  %v2182_v43 = vld [vmem:[%s3188_s10 + $0x20] sm:$0xff] }
 0xc4e   :  { %v1622_v50 = vsel %vm779_vm4, %v1620_v23, %v2241_v49  ;;  %v1623_v51 = vsel %vm779_vm4, %v1621_v31, %v2242_v48  ;;  %1831 = vmatpush.bf16.msrb.mxu3 %v2182_v43 }
 0xc4f   :  { %v1624_v53 = vpack.c.bf16 %v1623_v51, %v1622_v50 }
 0xc51   :  { %2107 = vmatmul.msk.bf16.vlgmr.msrb.gmra.mxu1 %vm230_vm0, %v1624_v53 }
 0xcce   :  { %v1659_v55 = vpop.f32.mrf.mxu1 }
 0xccf   :  { %v1660_v22 = vadd.f32 %v2254_v54, %v1659_v55 }
 0xcd1   :  { %v1664_v56 = vadd.f32 %v1660_v22, %v2982_v59 }
 0xcd3   :  { %v1670_v17 = vsel %vm230_vm0, %v1664_v56, 0.0 }
 0xcd4   :  { %1671 = vadd.xlane.f32.xlu1 %v1670_v17 }
 0xcd6   :  { %v1661_v44 = vpop.f32.mrf.mxu1 }
 0xcd7   :  { %v1662_v45 = vadd.f32 %v2254_v54, %v1661_v44 }
 0xcd9   :  { %v1665_v57 = vadd.f32 %v1662_v45, %v2984_v60  ;;  %v2181_v60 = vld [vmem:[%s3186_s8 + $0x18] sm:$0xff] }
 0xcda   :  { %1756 = vmatpush.bf16.msrb.mxu2 %v2181_v60 }
 0xcdb   :  { %v1673_v58 = vsel %vm230_vm0, %v1665_v57, 0.0 }
 0xcdc   :  { %1674 = vadd.xlane.f32.xlu2 %v1673_v58 }
 0xcde   :  { %1757 = vmatpush.bf16.msrb.mxu2 %v2180_v7 }
 0xd47   :  { %v1672_v46 = vpop.xlane.xlu1 %1671 }
 0xd48   :  { %v1676_v61 = vmul.f32 %v1672_v46, %v2934_v4 }
 0xd4a   :  { %v1678_v62 = vsub.f32 %v1664_v56, %v1676_v61 }
 0xd4c   :  { %v1680_v63 = vmul.f32 %v1678_v62, %v1678_v62 }
 0xd4e   :  { %v1682_v0 = vsel %vm230_vm0, %v1680_v63, 0.0 }
 0xd4f   :  { %v1675_v1 = vpop.xlane.xlu2 %1674  ;;  %1683 = vadd.xlane.f32.xlu0 %v1682_v0 }
 0xd50   :  { %v1677_v59 = vmul.f32 %v1675_v1, %v2934_v4 }
 0xd52   :  { %v1679_v52 = vsub.f32 %v1665_v57, %v1677_v59  ;;  %v2258_v59 = vld [vmem:[#allocation10 + $0x1] ss:$0 sm:$0xff] }
 0xd54   :  { %v1681_v2 = vmul.f32 %v1679_v52, %v1679_v52 }
 0xd56   :  { %v1685_v5 = vsel %vm230_vm0, %v1681_v2, 0.0 }
 0xd57   :  { %1686 = vadd.xlane.f32.xlu1 %v1685_v5 }
 0xdc2   :  { %v1684_v3 = vpop.xlane.xlu0 %1683 }
 0xdc3   :  { %v1688_v6 = vmul.f32 %v1684_v3, %v2934_v4 }
 0xdc5   :  { %v1690_v16 = vadd.f32 1e-12, %v1688_v6 }
 0xdc7   :  { %2341 = vrsqrt.f32 %v1690_v16  ;;  %vm1698_vm2 = vweird.f32 %v1690_v16 }
 0xdca   :  { %v1687_v10 = vpop.xlane.xlu1 %1686 }
 0xdcb   :  { %v1689_v11 = vmul.f32 %v1687_v10, %v2934_v4 }
 0xdcd   :  { %v2342_v13 = vpop.eup %2341  ;;  %v1691_v14 = vadd.f32 1e-12, %v1689_v11 }
 0xdce   :  { %v1693_v15 = vmul.f32 %v2342_v13, %v1690_v16  ;;  %vm1699_vm1 = vweird.f32 %v2342_v13 }
 0xdcf   :  { %2343 = vrsqrt.f32 %v1691_v14  ;;  %vm1700_vm3 = vmor %vm1698_vm2, %vm1699_vm1  ;;  %vm1708_vm8 = vweird.f32 %v1691_v14 }
 0xdd0   :  { %v1694_v9 = vmul.f32 %v2342_v13, %v1693_v15 }
 0xdd2   :  { %v1695_v18 = vmul.f32 0.5, %v1694_v9 }
 0xdd4   :  { %v1696_v19 = vsub.f32 1.5, %v1695_v18 }
 0xdd5   :  { %v2344_v33 = vpop.eup %2343 }
 0xdd6   :  { %v1697_v20 = vmul.f32 %v2342_v13, %v1696_v19  ;;  %v1703_v21 = vmul.f32 %v2344_v33, %v1691_v14  ;;  %vm1709_vm4 = vweird.f32 %v2344_v33 }
 0xdd7   :  { %vm1710_vm9 = vmor %vm1708_vm8, %vm1709_vm4 }
 0xdd8   :  { %v1704_v24 = vmul.f32 %v2344_v33, %v1703_v21  ;;  %v1701_v25 = vsel %vm1700_vm3, %v2342_v13, %v1697_v20 }
 0xdd9   :  { %v1712_v29 = vmul.f32 %v1701_v25, %v1678_v62 }
 0xdda   :  { %v1705_v26 = vmul.f32 0.5, %v1704_v24 }
 0xddb   :  { %v1717_v35 = vmul.f32 %v2255_v28, %v1712_v29  ;;  %v2186_v29 = vld [vmem:[#allocation13] sm:$0xff] }
 0xddc   :  { %v1706_v27 = vsub.f32 1.5, %v1705_v26  ;;  %v2187_v26 = vld [vmem:[#allocation13 + $0x8] sm:$0xff] }
 0xddd   :  { %v1722_v38 = vadd.f32 %v2256_v8, %v1717_v35  ;;  %1937 = vmatpush.bf16.msra.mxu0 %v2187_v26 }
 0xdde   :  { %v1707_v30 = vmul.f32 %v2344_v33, %v1706_v27 }
 0xde0   :  { %v1711_v34 = vsel %vm1710_vm9, %v2344_v33, %v1707_v30 }
 0xde1   :  { %v1713_v36 = vmul.f32 %v1711_v34, %v1679_v52  ;;  %1938 = vmatpush.bf16.msra.mxu0 %v2186_v29 }
 0xde3   :  { %v1718_v37 = vmul.f32 %v2255_v28, %v1713_v36 }
 0xde5   :  { %v1723_v39 = vadd.f32 %v2256_v8, %v1718_v37 }
 0xde7   :  { %v1724_v40 = vpack.c.bf16 %v1723_v39, %v1722_v38 }
 0xde9   :  { %2121 = vmatmul.msk.bf16.vlgmr.msrb.gmra.mxu2 %vm230_vm0, %v1724_v40 }
 0xe6c   :  { %v1759_v47 = vpop.f32.mrf.mxu2 }
 0xe6d   :  { %v1760_v48 = vadd.f32 %v2257_v32, %v1759_v47 }
 0xe6f   :  { %v1766_v49 = vmul.f32 0.044715, %v1760_v48  ;;  %v1764_v46 = vmul.f32 0.5, %v1760_v48 }
 0xe71   :  { %v1768_v31 = vmul.f32 %v1766_v49, %v1760_v48 }
 0xe73   :  { %v1770_v23 = vmul.f32 %v1768_v31, %v1760_v48 }
 0xe74   :  { %v1761_v50 = vpop.f32.mrf.mxu2 }
 0xe75   :  { %v1772_v51 = vadd.f32 %v1770_v23, %v1760_v48  ;;  %v1762_v53 = vadd.f32 %v2257_v32, %v1761_v50  ;;  %v2260_v48 = vld [vmem:[#allocation11 + $0x1] ss:$0 sm:$0xff] }
 0xe77   :  { %v1767_v54 = vmul.f32 0.044715, %v1762_v53  ;;  %v1774_v55 = vmul.f32 0.7978845, %v1772_v51  ;;  %v1765_v61 = vmul.f32 0.5, %v1762_v53 }
 0xe79   :  { %v1769_v22 = vmul.f32 %v1767_v54, %v1762_v53  ;;  %2345 = vtanh.f32 %v1774_v55 }
 0xe7b   :  { %v1771_v56 = vmul.f32 %v1769_v22, %v1762_v53 }
 0xe7d   :  { %v1773_v17 = vadd.f32 %v1771_v56, %v1762_v53 }
 0xe7f   :  { %v1775_v44 = vmul.f32 0.7978845, %v1773_v17  ;;  %v2346_v45 = vpop.eup %2345 }
 0xe80   :  { %v1778_v57 = vadd.f32 1.0, %v2346_v45 }
 0xe81   :  { %2347 = vtanh.f32 %v1775_v44 }
 0xe82   :  { %v1780_v63 = vmul.f32 %v1778_v57, %v1764_v46  ;;  %v2189_v57 = vld [vmem:[#allocation14 + $0x8] sm:$0xff]  ;;  %v2261_v46 = vld [vmem:[%s3193_s15] ss:$0 sm:$0xff] }
 0xe83   :  { %1975 = vmatpush.bf16.msra.mxu1 %v2189_v57 }
 0xe87   :  { %v2348_v58 = vpop.eup %2347 }
 0xe88   :  { %v1779_v62 = vadd.f32 1.0, %v2348_v58  ;;  %v2188_v58 = vld [vmem:[#allocation14] sm:$0xff] }
 0xe89   :  { %1976 = vmatpush.bf16.msra.mxu1 %v2188_v58 }
 0xe8a   :  { %v1781_v0 = vmul.f32 %v1779_v62, %v1765_v61 }
 0xe8c   :  { %v1782_v1 = vpack.c.bf16 %v1781_v0, %v1780_v63 }
 0xe8e   :  { %2146 = vmatmul.msk.bf16.vlgmr.msrb.gmra.mxu3 %vm978_vm12, %v1782_v1 }
 0xf11   :  { %v1833_v52 = vpop.f32.mrf.mxu3 }
 0xf12   :  { %v1834_v2 = vadd.f32 %v2258_v59, %v1833_v52 }
 0xf14   :  { %v1838_v5 = vadd.f32 %v1834_v2, %v1722_v38 }
 0xf16   :  { %v1844_v60 = vsel %vm230_vm0, %v1838_v5, 0.0 }
 0xf17   :  { %1845 = vadd.xlane.f32.xlu0 %v1844_v60 }
 0xf19   :  { %v1835_v3 = vpop.f32.mrf.mxu3 }
 0xf1a   :  { %v1836_v6 = vadd.f32 %v2258_v59, %v1835_v3  ;;  %v2262_v59 = vld [vmem:[#allocation16] ss:$0 sm:$0xff] }
 0xf1c   :  { %v1839_v16 = vadd.f32 %v1836_v6, %v1723_v39 }
 0xf1e   :  { %v1847_v7 = vsel %vm230_vm0, %v1839_v16, 0.0 }
 0xf1f   :  { %1848 = vadd.xlane.f32.xlu2 %v1847_v7 }
 0xf8a   :  { %v1846_v10 = vpop.xlane.xlu0 %1845 }
 0xf8b   :  { %v1850_v11 = vmul.f32 %v1846_v10, %v2934_v4 }
 0xf8d   :  { %v1852_v13 = vsub.f32 %v1838_v5, %v1850_v11 }
 0xf8f   :  { %v1854_v14 = vmul.f32 %v1852_v13, %v1852_v13 }
 0xf91   :  { %v1856_v15 = vsel %vm230_vm0, %v1854_v14, 0.0 }
 0xf92   :  { %v1849_v9 = vpop.xlane.xlu2 %1848  ;;  %1857 = vadd.xlane.f32.xlu2 %v1856_v15 }
 0xf93   :  { %v1851_v18 = vmul.f32 %v1849_v9, %v2934_v4 }
 0xf95   :  { %v1853_v19 = vsub.f32 %v1839_v16, %v1851_v18 }
 0xf97   :  { %v1855_v33 = vmul.f32 %v1853_v19, %v1853_v19 }
 0xf99   :  { %v1859_v20 = vsel %vm230_vm0, %v1855_v33, 0.0 }
 0xf9a   :  { %1860 = vadd.xlane.f32.xlu1 %v1859_v20 }
0x1005   :  { %v1858_v21 = vpop.xlane.xlu2 %1857 }
0x1006   :  { %v1862_v24 = vmul.f32 %v1858_v21, %v2934_v4 }
0x1008   :  { %v1864_v25 = vadd.f32 1e-12, %v1862_v24 }
0x100a   :  { %2349 = vrsqrt.f32 %v1864_v25  ;;  %vm1872_vm11 = vweird.f32 %v1864_v25 }
0x100d   :  { %v1861_v27 = vpop.xlane.xlu1 %1860 }
0x100e   :  { %v1863_v28 = vmul.f32 %v1861_v27, %v2934_v4  ;;  %v2259_v4 = vld [vmem:[%s3190_s12 + $0x1] ss:$0 sm:$0xff] }
0x1010   :  { %v2350_v30 = vpop.eup %2349  ;;  %v1865_v34 = vadd.f32 1e-12, %v1863_v28 }
0x1011   :  { %v1867_v8 = vmul.f32 %v2350_v30, %v1864_v25  ;;  %vm1873_vm10 = vweird.f32 %v2350_v30 }
0x1012   :  { %2351 = vrsqrt.f32 %v1865_v34  ;;  %vm1874_vm12 = vmor %vm1872_vm11, %vm1873_vm10  ;;  %vm1882_vm14 = vweird.f32 %v1865_v34 }
0x1013   :  { %v1868_v35 = vmul.f32 %v2350_v30, %v1867_v8 }
0x1015   :  { %v1869_v36 = vmul.f32 0.5, %v1868_v35 }
0x1017   :  { %v1870_v37 = vsub.f32 1.5, %v1869_v36 }
0x1018   :  { %v2352_v38 = vpop.eup %2351 }
0x1019   :  { %v1871_v39 = vmul.f32 %v2350_v30, %v1870_v37  ;;  %v1877_v40 = vmul.f32 %v2352_v38, %v1865_v34  ;;  %vm1883_vm13 = vweird.f32 %v2352_v38 }
0x101a   :  { %vm1884_vm15 = vmor %vm1882_vm14, %vm1883_vm13 }
0x101b   :  { %v1875_v12 = vsel %vm1874_vm12, %v2350_v30, %v1871_v39  ;;  %v1878_v41 = vmul.f32 %v2352_v38, %v1877_v40 }
0x101c   :  { %v1886_v43 = vmul.f32 %v1875_v12, %v1852_v13 }
0x101d   :  { %v1879_v42 = vmul.f32 0.5, %v1878_v41 }
0x101e   :  { %v1891_v49 = vmul.f32 %v2259_v4, %v1886_v43 }
0x101f   :  { %v1880_v32 = vsub.f32 1.5, %v1879_v42 }
0x1020   :  { %v1896_v50 = vadd.f32 %v2260_v48, %v1891_v49 }
0x1021   :  { %v1881_v47 = vmul.f32 %v2352_v38, %v1880_v32 }
0x1022   :  { %v1898_v54 = vpack.c.bf16 %v1896_v50, %v1896_v50 }
0x1023   :  { %v1885_v31 = vsel %vm1884_vm15, %v2352_v38, %v1881_v47 }
0x1024   :  { %v1887_v23 = vmul.f32 %v1885_v31, %v1853_v19  ;;  %v1910_v56 = vunpack.c.l.b16 %v1898_v54 }
0x1026   :  { %v1892_v51 = vmul.f32 %v2259_v4, %v1887_v23 }
0x1028   :  { %v1897_v53 = vadd.f32 %v2260_v48, %v1892_v51 }
0x102a   :  { %v1899_v55 = vpack.c.bf16 %v1897_v53, %v1897_v53 }
0x102c   :  { %v1911_v22 = vunpack.c.l.b16 %v1899_v55 }
0x102e   :  { %v1912_v17 = vrot.slane %v1911_v22, 7 }
0x1030   :  { %v1914_v44 = vsel %vm1913_vm5, %v1912_v17, %v1910_v56 }
0x1031   :  { %v1915_v45 = vpack.c.b16 %v1914_v44, %v1914_v44 }
0x1033   :  { %2156 = vmatmul.msk.bf16.vlgmr.msra.gmra.mxu0 %vm230_vm0, %v1915_v45 }
0x10b0   :  { %v1940_v61 = vpop.f32.mrf.mxu0 }
0x10b1   :  { %v1941_v62 = vadd.f32 %v2261_v46, %v1940_v61 }
0x10b3   :  { %2353 = vtanh.f32 %v1941_v62 }
0x10b8   :  { %v1942_v63 = vpop.f32.mrf.mxu0 }
0x10b9   :  { %v2354_v0 = vpop.eup %2353 }
0x10ba   :  { %v1945_v1 = vpack.c.bf16 %v2354_v0, %v2354_v0 }
0x10bc   :  { %2165 = vmatmul.msk.bf16.vlgmr.msra.gmra.mxu1 %vm230_vm0, %v1945_v1 }
0x1139   :  { %v1978_v52 = vpop.f32.mrf.mxu1 }
0x113a   :  { %v1979_v2 = vadd.f32 %v2262_v59, %v1978_v52 }
0x113c   :  { %1982 = vst [vmem:[#allocation17] sm:$0x3] %v1979_v2 }
0x113d   :  { %1993 = dma.vmem_to_hbm [thread:$0]  %s1989_s2, 32, %s1991_s25, [#allocation4]  }
0x1141   :  { %v1980_v5 = vpop.f32.mrf.mxu1 }
0x1142   :  { %2607 = dma.done.wait [#allocation4], 32  }
0x1143   :  { %2608 = vsyncadd [#allocation4], 4294967264 }
0x1144   :  { %1998 = vsyncpa [#allocation3], 1 }
0x1145   :  { %1999 = vsyncpa [#allocation6], 1 }
0x1146   :  { %2000 = vsyncpa [#allocation9], 1 }
0x1147   :  { %2001 = vsyncpa [#allocation12], 1 }
0x1148   :  { %2002 = vsyncpa [#allocation15], 1 }
0x1149   :  { %2003 = vsyncpa [#allocation4], 1 }

</bundles_post_ra>
